<compile_context>
chip_gen: v7x
topology: tpu7x:2x2x1
jax: 0.10.0
libtpu: 0.0.40
codegen_flags: <defaults>
</compile_context>

<pallas_src>
import jax
import jax.numpy as jnp
from jax.experimental import pallas as pl
from jax.experimental.pallas import tpu as pltpu


def _round_up(n: int, m: int) -> int:
    return ((n + m - 1) // m) * m


# ----------------------------------------------------------------------------
# Kernel
# ----------------------------------------------------------------------------
def _make_vae_kernel(n_enc_hidden, n_dec_hidden, non_linear, z_dim, d_in,
                     d_out_pad, out_dims, bias_offsets, compute_dtype):
    """Fused VAE forward kernel.

    Ref order:
      x_ref, eps_ref,
      w_0 ... w_{L-1},        # pre-cast weights: enc hidden, fused head,
                              # dec hidden, dec mean   (L layers total)
      b_packed_ref,           # all biases packed into one (1, total) f32 row
      out_ref                 # (TB, d_out_pad) lane-dense slab:
                              #   [:, :2z] = mu || logvar
                              #   [:, 2z:2z+d_in] = x_recon_mu
    """
    n_layers = n_enc_hidden + 1 + n_dec_hidden + 1

    def kernel(*refs):
        x_ref, eps_ref = refs[0], refs[1]
        w_refs = refs[2:2 + n_layers]
        b_ref = refs[2 + n_layers]
        out_ref = refs[3 + n_layers]

        def linear(h, li):
            w = w_refs[li][...]                                  # pre-cast
            off = bias_offsets[li]
            b = b_ref[:, off:off + out_dims[li]]                 # (1, n) f32
            return jnp.dot(h.astype(compute_dtype), w,
                           preferred_element_type=jnp.float32) + b

        li = 0

        # ---- Encoder hidden layers ------------------------------------
        h = x_ref[...].astype(jnp.float32)
        for _ in range(n_enc_hidden):
            h = linear(h, li)
            li += 1
            if non_linear:
                h = jnp.maximum(h, 0.0)

        # ---- Fused mean / logvar head ----------------------------------
        mulv = linear(h, li)
        li += 1
        mu = mulv[:, :z_dim]
        logvar = mulv[:, z_dim:]

        # ---- Reparameterise: z = mu + eps * exp(0.5 * logvar) ----------
        eps = eps_ref[...].astype(jnp.float32)
        h = mu + eps * jnp.exp(0.5 * logvar)

        # ---- Decoder hidden layers --------------------------------------
        for _ in range(n_dec_hidden):
            h = linear(h, li)
            li += 1
            if non_linear:
                h = jnp.maximum(h, 0.0)

        # ---- Decoder mean head ------------------------------------------
        xrec = linear(h, li)
        li += 1

        # ---- ONE lane-dense store: [mu||logvar | x_recon | zero-pad] ----
        tb = out_ref.shape[0]
        pad_cols = d_out_pad - (2 * z_dim + d_in)
        pieces = [mulv, xrec]
        if pad_cols > 0:
            pieces.append(jnp.zeros((tb, pad_cols), jnp.float32))
        out_ref[...] = jnp.concatenate(pieces, axis=1).astype(out_ref.dtype)

    return kernel


# ----------------------------------------------------------------------------
# Wrapper (parameter setup = glue; hot path = single fused Pallas kernel)
# ----------------------------------------------------------------------------
class VAEPallas:
    """JAX/Pallas equivalent of the PyTorch `VAE` forward pass."""

    def __init__(self, input_dim, hidden_dim, latent_dim, non_linear=False,
                 init_logvar=-3.0, compute_dtype=jnp.float32,
                 weight_pipeline_mode=None, key=None):
        self.input_dim = input_dim
        self.hidden_dim = list(hidden_dim) + [latent_dim]   # as in VAE.__init__
        self.latent_dim = latent_dim
        self.non_linear = non_linear
        self.compute_dtype = compute_dtype
        # On v7x (64 MiB VMEM/TC) pass pl.Buffered(1) to single-buffer the
        # VMEM-resident weights when scaling TB / hidden_dim.
        self.weight_pipeline_mode = weight_pipeline_mode

        if key is None:
            key = jax.random.PRNGKey(0)

        # nn.Linear-style init: uniform in +/- 1/sqrt(fan_in).
        def init_linear(k, d_in, d_out):
            kw, kb = jax.random.split(k)
            bound = 1.0 / (float(d_in) ** 0.5)
            w = jax.random.uniform(kw, (d_in, d_out), jnp.float32, -bound, bound)
            b = jax.random.uniform(kb, (1, d_out), jnp.float32, -bound, bound)
            return w, b

        enc_dims = [input_dim] + self.hidden_dim            # e.g. [64,32,16,8]
        dec_dims = self.hidden_dim[::-1] + [input_dim]      # e.g. [8,16,32,64]

        n_enc_pairs = len(enc_dims) - 1
        n_dec_pairs = len(dec_dims) - 1
        n_keys = (n_enc_pairs - 1) + 2 + (n_dec_pairs - 1) + 1
        keys = list(jax.random.split(key, n_keys))
        kit = iter(keys)

        # Encoder hidden layers (all Linear pairs except the last).
        self.enc_hidden = []
        for i in range(n_enc_pairs - 1):
            self.enc_hidden.append(
                init_linear(next(kit), enc_dims[i], enc_dims[i + 1]))

        # mean / logvar heads (dims[-2] -> latent_dim); keep unfused copies
        # for the pure-JAX reference, fuse for the kernel.
        self.wm, self.bm = init_linear(next(kit), enc_dims[-2], enc_dims[-1])
        self.wl, self.bl = init_linear(next(kit), enc_dims[-2], enc_dims[-1])
        self.w_heads = jnp.concatenate([self.wm, self.wl], axis=1)  # [h, 2z]
        self.b_heads = jnp.concatenate([self.bm, self.bl], axis=1)  # [1, 2z]

        # Decoder hidden layers (all Linear pairs except the last).
        self.dec_hidden = []
        for i in range(n_dec_pairs - 1):
            self.dec_hidden.append(
                init_linear(next(kit), dec_dims[i], dec_dims[i + 1]))

        # Decoder mean head (dims[-2] -> input_dim).
        self.w_dec_mean, self.b_dec_mean = init_linear(
            next(kit), dec_dims[-2], dec_dims[-1])

        # Learnable output log-variance (batch-independent).
        self.logvar_out = jnp.full((1, input_dim), init_logvar, jnp.float32)

        # ---- Build the packed kernel parameter set ------------------------
        if non_linear:
            layers = (list(self.enc_hidden)
                      + [(self.w_heads, self.b_heads)]
                      + list(self.dec_hidden)
                      + [(self.w_dec_mean, self.b_dec_mean)])
            self._n_enc_kernel = len(self.enc_hidden)
            self._n_dec_kernel = len(self.dec_hidden)
        else:
            # No ReLUs: encoder chain (incl. fused head) and decoder chain are
            # each one affine map -> collapse on the host (algebraically
            # identical, kernel does exactly 2 matmuls + reparameterise).
            def collapse(pairs):
                w_t, b_t = pairs[0]
                for w, b in pairs[1:]:
                    w_t = w_t @ w
                    b_t = b_t @ w + b
                return w_t, b_t
            enc_total = collapse(list(self.enc_hidden)
                                 + [(self.w_heads, self.b_heads)])
            dec_total = collapse(list(self.dec_hidden)
                                 + [(self.w_dec_mean, self.b_dec_mean)])
            layers = [enc_total, dec_total]
            self._n_enc_kernel = 0
            self._n_dec_kernel = 0

        # Pre-cast weights once (no per-step VPU casts, fewer DMA bytes for
        # bf16 compute).
        self._kernel_weights = [w.astype(compute_dtype) for w, _ in layers]
        self._out_dims = tuple(int(w.shape[1]) for w, _ in layers)

        # Pack all biases into ONE (1, total) f32 row with 128-aligned segment
        # starts -> one DMA instead of one tiny DMA per layer.
        offs, total = [], 0
        for d in self._out_dims:
            offs.append(total)
            total += _round_up(d, 128)
        total = max(total, 128)
        bias_packed = jnp.zeros((1, total), jnp.float32)
        for (_, b), off, d in zip(layers, offs, self._out_dims):
            bias_packed = bias_packed.at[:, off:off + d].set(b)
        self._bias_packed = bias_packed
        self._bias_offsets = tuple(offs)

    # ------------------------------------------------------------------ ref
    def reference(self, x, eps):
        """Pure-JAX mirror of the PyTorch forward (same eps)."""
        h = x
        for w, b in self.enc_hidden:
            h = h @ w + b
            if self.non_linear:
                h = jax.nn.relu(h)
        mu = h @ self.wm + self.bm
        logvar = h @ self.wl + self.bl
        z = mu + eps * jnp.exp(0.5 * logvar)
        h = z
        for w, b in self.dec_hidden:
            h = h @ w + b
            if self.non_linear:
                h = jax.nn.relu(h)
        x_recon_mu = h @ self.w_dec_mean + self.b_dec_mean
        return mu, logvar, x_recon_mu

    # -------------------------------------------------------------- forward
    def __call__(self, x, eps, tile_batch=1024):
        B = x.shape[0]
        z = self.latent_dim
        d_in = self.input_dim
        d_out = 2 * z + d_in
        d_out_pad = _round_up(d_out, 128)          # lane-dense output slab

        # Batch tile: multiple of 8 sublanes, as large as the cap allows so
        # small batches run in ONE grid step with at most 7 padded rows.
        TB = min(_round_up(tile_batch, 8), _round_up(B, 8))
        n_blocks = pl.cdiv(B, TB)
        B_pad = n_blocks * TB
        if B_pad != B:
            x = jnp.pad(x, ((0, B_pad - B), (0, 0)))
            eps = jnp.pad(eps, ((0, B_pad - B), (0, 0)))

        kernel = _make_vae_kernel(
            self._n_enc_kernel, self._n_dec_kernel, self.non_linear,
            z, d_in, d_out_pad, self._out_dims, self._bias_offsets,
            self.compute_dtype)

        # Weights pinned to block (0, 0) every step -> fetched once,
        # VMEM-resident across the grid.
        def resident(arr):
            if self.weight_pipeline_mode is None:
                return pl.BlockSpec(arr.shape, lambda i: (0, 0))
            return pl.BlockSpec(arr.shape, lambda i: (0, 0),
                                pipeline_mode=self.weight_pipeline_mode)

        inputs = [x, eps] + self._kernel_weights + [self._bias_packed]
        in_specs = ([pl.BlockSpec((TB, d_in), lambda i: (i, 0)),
                     pl.BlockSpec((TB, z), lambda i: (i, 0))]
                    + [resident(w) for w in self._kernel_weights]
                    + [resident(self._bias_packed)])

        out_shape = jax.ShapeDtypeStruct((B_pad, d_out_pad), jnp.float32)
        out_specs = pl.BlockSpec((TB, d_out_pad), lambda i: (i, 0))

        # VMEM budget: double-buffered activation/output tiles + (possibly
        # double-buffered) resident params; clamp to ~48 MiB usable on v7x.
        itemsize = jnp.dtype(self.compute_dtype).itemsize
        act_bytes = 2 * TB * (d_in + z + d_out_pad) * 4
        par_bytes = 2 * (sum(w.size for w in self._kernel_weights) * itemsize
                         + self._bias_packed.size * 4)
        vmem_limit = int(min(max(2 * (act_bytes + par_bytes), 32 * 2**20),
                             48 * 2**20))

        out = pl.pallas_call(
            kernel,
            out_shape=out_shape,
            grid=(n_blocks,),
            in_specs=in_specs,
            out_specs=out_specs,
            compiler_params=pltpu.CompilerParams(
                dimension_semantics=("parallel",),   # megacore when n_blocks>1
                vmem_limit_bytes=vmem_limit),
        )(*inputs)

        # Strip batch padding and split the lane-dense slab (free slices).
        mu = out[:B, :z]
        logvar = out[:B, z:2 * z]
        x_recon_mu = out[:B, 2 * z:2 * z + d_in]

        # Normal(loc=x_recon_mu, scale=exp(0.5*logvar_out)); scale is a
        # batch-independent parameter, computed outside the kernel.
        x_recon_scale = jnp.exp(0.5 * self.logvar_out)

        return {
            "x_recon_mu": x_recon_mu,
            "x_recon_scale": x_recon_scale,
            "mu": mu,
            "logvar": logvar,
        }


# ----------------------------------------------------------------------------
# Demo / self-test
# ----------------------------------------------------------------------------
if __name__ == "__main__":
    key = jax.random.PRNGKey(0)
    k_params, k_x, k_eps, k_params2 = jax.random.split(key, 4)

    batch = 300                 # non-multiple of 8 -> exercises 4-row padding
    input_dim = 64
    hidden_dim = [32, 16]
    latent_dim = 8

    x = jax.random.normal(k_x, (batch, input_dim), dtype=jnp.float32)
    eps = jax.random.normal(k_eps, (batch, latent_dim), dtype=jnp.float32)

    def check(out, vae, atol=2e-4):
        mu_ref, logvar_ref, xrec_ref = vae.reference(x, eps)
        assert out["mu"].shape == (batch, latent_dim)
        assert out["logvar"].shape == (batch, latent_dim)
        assert out["x_recon_mu"].shape == (batch, input_dim)
        assert out["x_recon_scale"].shape == (1, input_dim)
        assert jnp.allclose(out["mu"], mu_ref, atol=atol, rtol=atol)
        assert jnp.allclose(out["logvar"], logvar_ref, atol=atol, rtol=atol)
        assert jnp.allclose(out["x_recon_mu"], xrec_ref, atol=atol, rtol=atol)
        assert jnp.allclose(out["x_recon_scale"],
                            jnp.exp(0.5 * vae.logvar_out), atol=1e-6)

    # 1) Non-linear VAE, single grid step (TB = round_up(300, 8) = 304).
    vae = VAEPallas(input_dim, hidden_dim, latent_dim,
                    non_linear=True, key=k_params)
    out = vae(x, eps)
    jax.block_until_ready(out)
    check(out, vae)

    # 2) Same model, forced multi-block grid (exercises pipelining/padding).
    out_mb = vae(x, eps, tile_batch=64)
    jax.block_until_ready(out_mb)
    check(out_mb, vae)
    assert jnp.allclose(out_mb["x_recon_mu"], out["x_recon_mu"],
                        atol=1e-5, rtol=1e-5)

    # 3) Linear VAE: affine chains collapsed on host -> kernel = 2 matmuls.
    vae_lin = VAEPallas(input_dim, hidden_dim, latent_dim,
                        non_linear=False, key=k_params2)
    out_lin = vae_lin(x, eps)
    jax.block_until_ready(out_lin)
    check(out_lin, vae_lin)

    print("KERNEL_OK")
</pallas_src>

<mosaic_0001>
module attributes {stable_mosaic.version = 11 : i64} {
  func.func @kernel(%arg0: i32, %arg1: memref<304x64xf32, #tpu.memory_space<vmem>>, %arg2: memref<304x8xf32, #tpu.memory_space<vmem>>, %arg3: memref<64x32xf32, #tpu.memory_space<vmem>>, %arg4: memref<32x16xf32, #tpu.memory_space<vmem>>, %arg5: memref<16x16xf32, #tpu.memory_space<vmem>>, %arg6: memref<8x16xf32, #tpu.memory_space<vmem>>, %arg7: memref<16x32xf32, #tpu.memory_space<vmem>>, %arg8: memref<32x64xf32, #tpu.memory_space<vmem>>, %arg9: memref<1x768xf32, #tpu.memory_space<vmem>>, %arg10: memref<304x128xf32, #tpu.memory_space<vmem>>) attributes {dimension_semantics = [#tpu.dimension_semantics<parallel>], iteration_bounds = array<i64: 1>, scalar_prefetch = 0 : i64, scratch_operands = 0 : i64, tpu.core_type = #tpu.core_type<tc>, window_params = [{transform_indices = @transform_0, window_bounds = array<i64: 304, 64>}, {transform_indices = @transform_1, window_bounds = array<i64: 304, 8>}, {pipeline_mode = #tpu.pipeline_mode<synchronous>, transform_indices = @transform_2, window_bounds = array<i64: 64, 32>}, {pipeline_mode = #tpu.pipeline_mode<synchronous>, transform_indices = @transform_3, window_bounds = array<i64: 32, 16>}, {pipeline_mode = #tpu.pipeline_mode<synchronous>, transform_indices = @transform_4, window_bounds = array<i64: 16, 16>}, {pipeline_mode = #tpu.pipeline_mode<synchronous>, transform_indices = @transform_5, window_bounds = array<i64: 8, 16>}, {pipeline_mode = #tpu.pipeline_mode<synchronous>, transform_indices = @transform_6, window_bounds = array<i64: 16, 32>}, {pipeline_mode = #tpu.pipeline_mode<synchronous>, transform_indices = @transform_7, window_bounds = array<i64: 32, 64>}, {pipeline_mode = #tpu.pipeline_mode<synchronous>, transform_indices = @transform_8, window_bounds = array<i64: 1, 768>}, {transform_indices = @transform_9, window_bounds = array<i64: 304, 128>}]} {
    %c0 = arith.constant 0 : index
    %c0_0 = arith.constant 0 : index
    %0 = vector.load %arg1[%c0, %c0_0] : memref<304x64xf32, #tpu.memory_space<vmem>>, vector<304x64xf32>
    %c0_1 = arith.constant 0 : index
    %c0_2 = arith.constant 0 : index
    %1 = vector.load %arg3[%c0_1, %c0_2] : memref<64x32xf32, #tpu.memory_space<vmem>>, vector<64x32xf32>
    %c0_3 = arith.constant 0 : index
    %c0_4 = arith.constant 0 : index
    %2 = vector.load %arg9[%c0_3, %c0_4] : memref<1x768xf32, #tpu.memory_space<vmem>>, vector<1x32xf32>
    %cst = arith.constant dense<0.000000e+00> : vector<304x32xf32>
    %3 = tpu.matmul %0, %1, %cst {dimension_numbers = #tpu.dot_dimension_numbers<[1], [0], [0], [1], [0, 0, 1, 1], [], []>} : vector<304x64xf32>, vector<64x32xf32>, vector<304x32xf32> -> vector<304x32xf32>
    %4 = vector.broadcast %2 : vector<1x32xf32> to vector<304x32xf32>
    %5 = arith.addf %3, %4 : vector<304x32xf32>
    %cst_5 = arith.constant 0.000000e+00 : f32
    %6 = vector.broadcast %cst_5 : f32 to vector<304x32xf32>
    %7 = arith.maximumf %5, %6 : vector<304x32xf32>
    %c0_6 = arith.constant 0 : index
    %c0_7 = arith.constant 0 : index
    %8 = vector.load %arg4[%c0_6, %c0_7] : memref<32x16xf32, #tpu.memory_space<vmem>>, vector<32x16xf32>
    %c0_8 = arith.constant 0 : index
    %c128 = arith.constant 128 : index
    %9 = vector.load %arg9[%c0_8, %c128] : memref<1x768xf32, #tpu.memory_space<vmem>>, vector<1x16xf32>
    %cst_9 = arith.constant dense<0.000000e+00> : vector<304x16xf32>
    %10 = tpu.matmul %7, %8, %cst_9 {dimension_numbers = #tpu.dot_dimension_numbers<[1], [0], [0], [1], [0, 0, 1, 1], [], []>} : vector<304x32xf32>, vector<32x16xf32>, vector<304x16xf32> -> vector<304x16xf32>
    %11 = vector.broadcast %9 : vector<1x16xf32> to vector<304x16xf32>
    %12 = arith.addf %10, %11 : vector<304x16xf32>
    %cst_10 = arith.constant 0.000000e+00 : f32
    %13 = vector.broadcast %cst_10 : f32 to vector<304x16xf32>
    %14 = arith.maximumf %12, %13 : vector<304x16xf32>
    %c0_11 = arith.constant 0 : index
    %c0_12 = arith.constant 0 : index
    %15 = vector.load %arg5[%c0_11, %c0_12] : memref<16x16xf32, #tpu.memory_space<vmem>>, vector<16x16xf32>
    %c0_13 = arith.constant 0 : index
    %c256 = arith.constant 256 : index
    %16 = vector.load %arg9[%c0_13, %c256] : memref<1x768xf32, #tpu.memory_space<vmem>>, vector<1x16xf32>
    %cst_14 = arith.constant dense<0.000000e+00> : vector<304x16xf32>
    %17 = tpu.matmul %14, %15, %cst_14 {dimension_numbers = #tpu.dot_dimension_numbers<[1], [0], [0], [1], [0, 0, 1, 1], [], []>} : vector<304x16xf32>, vector<16x16xf32>, vector<304x16xf32> -> vector<304x16xf32>
    %18 = vector.broadcast %16 : vector<1x16xf32> to vector<304x16xf32>
    %19 = arith.addf %17, %18 : vector<304x16xf32>
    %20 = vector.extract_strided_slice %19 {offsets = [0, 0], sizes = [304, 8], strides = [1, 1]} : vector<304x16xf32> to vector<304x8xf32>
    %21 = vector.extract_strided_slice %19 {offsets = [0, 8], sizes = [304, 8], strides = [1, 1]} : vector<304x16xf32> to vector<304x8xf32>
    %c0_15 = arith.constant 0 : index
    %c0_16 = arith.constant 0 : index
    %22 = vector.load %arg2[%c0_15, %c0_16] : memref<304x8xf32, #tpu.memory_space<vmem>>, vector<304x8xf32>
    %cst_17 = arith.constant 5.000000e-01 : f32
    %23 = vector.broadcast %cst_17 : f32 to vector<304x8xf32>
    %24 = arith.mulf %23, %21 : vector<304x8xf32>
    %25 = math.exp %24 : vector<304x8xf32>
    %26 = arith.mulf %22, %25 : vector<304x8xf32>
    %27 = arith.addf %20, %26 : vector<304x8xf32>
    %c0_18 = arith.constant 0 : index
    %c0_19 = arith.constant 0 : index
    %28 = vector.load %arg6[%c0_18, %c0_19] : memref<8x16xf32, #tpu.memory_space<vmem>>, vector<8x16xf32>
    %c0_20 = arith.constant 0 : index
    %c384 = arith.constant 384 : index
    %29 = vector.load %arg9[%c0_20, %c384] : memref<1x768xf32, #tpu.memory_space<vmem>>, vector<1x16xf32>
    %cst_21 = arith.constant dense<0.000000e+00> : vector<304x16xf32>
    %30 = tpu.matmul %27, %28, %cst_21 {dimension_numbers = #tpu.dot_dimension_numbers<[1], [0], [0], [1], [0, 0, 1, 1], [], []>} : vector<304x8xf32>, vector<8x16xf32>, vector<304x16xf32> -> vector<304x16xf32>
    %31 = vector.broadcast %29 : vector<1x16xf32> to vector<304x16xf32>
    %32 = arith.addf %30, %31 : vector<304x16xf32>
    %cst_22 = arith.constant 0.000000e+00 : f32
    %33 = vector.broadcast %cst_22 : f32 to vector<304x16xf32>
    %34 = arith.maximumf %32, %33 : vector<304x16xf32>
    %c0_23 = arith.constant 0 : index
    %c0_24 = arith.constant 0 : index
    %35 = vector.load %arg7[%c0_23, %c0_24] : memref<16x32xf32, #tpu.memory_space<vmem>>, vector<16x32xf32>
    %c0_25 = arith.constant 0 : index
    %c512 = arith.constant 512 : index
    %36 = vector.load %arg9[%c0_25, %c512] : memref<1x768xf32, #tpu.memory_space<vmem>>, vector<1x32xf32>
    %cst_26 = arith.constant dense<0.000000e+00> : vector<304x32xf32>
    %37 = tpu.matmul %34, %35, %cst_26 {dimension_numbers = #tpu.dot_dimension_numbers<[1], [0], [0], [1], [0, 0, 1, 1], [], []>} : vector<304x16xf32>, vector<16x32xf32>, vector<304x32xf32> -> vector<304x32xf32>
    %38 = vector.broadcast %36 : vector<1x32xf32> to vector<304x32xf32>
    %39 = arith.addf %37, %38 : vector<304x32xf32>
    %cst_27 = arith.constant 0.000000e+00 : f32
    %40 = vector.broadcast %cst_27 : f32 to vector<304x32xf32>
    %41 = arith.maximumf %39, %40 : vector<304x32xf32>
    %c0_28 = arith.constant 0 : index
    %c0_29 = arith.constant 0 : index
    %42 = vector.load %arg8[%c0_28, %c0_29] : memref<32x64xf32, #tpu.memory_space<vmem>>, vector<32x64xf32>
    %c0_30 = arith.constant 0 : index
    %c640 = arith.constant 640 : index
    %43 = vector.load %arg9[%c0_30, %c640] : memref<1x768xf32, #tpu.memory_space<vmem>>, vector<1x64xf32>
    %cst_31 = arith.constant dense<0.000000e+00> : vector<304x64xf32>
    %44 = tpu.matmul %41, %42, %cst_31 {dimension_numbers = #tpu.dot_dimension_numbers<[1], [0], [0], [1], [0, 0, 1, 1], [], []>} : vector<304x32xf32>, vector<32x64xf32>, vector<304x64xf32> -> vector<304x64xf32>
    %45 = vector.broadcast %43 : vector<1x64xf32> to vector<304x64xf32>
    %46 = arith.addf %44, %45 : vector<304x64xf32>
    %cst_32 = arith.constant 0.000000e+00 : f32
    %47 = vector.broadcast %cst_32 : f32 to vector<304x48xf32>
    %48 = tpu.concatenate %19, %46, %47 in 1 : vector<304x16xf32>, vector<304x64xf32>, vector<304x48xf32> -> vector<304x128xf32>
    %c0_33 = arith.constant 0 : index
    %c0_34 = arith.constant 0 : index
    %49 = vector.load %arg10[%c0_33, %c0_34] : memref<304x128xf32, #tpu.memory_space<vmem>>, vector<304x128xf32>
    tpu.vector_store %arg10[%c0_33, %c0_34], %48 {strides = array<i32>} : memref<304x128xf32, #tpu.memory_space<vmem>>, vector<304x128xf32>,
    return
  }
  func.func @transform_0(%arg0: i32) -> (i32, i32) {
    %c0_i32 = arith.constant 0 : i32
    %c0_i32_0 = arith.constant 0 : i32
    return %arg0, %c0_i32 : i32, i32
  }
  func.func @transform_1(%arg0: i32) -> (i32, i32) {
    %c0_i32 = arith.constant 0 : i32
    %c0_i32_0 = arith.constant 0 : i32
    return %arg0, %c0_i32 : i32, i32
  }
  func.func @transform_2(%arg0: i32) -> (i32, i32) {
    %c0_i32 = arith.constant 0 : i32
    %c0_i32_0 = arith.constant 0 : i32
    %c0_i32_1 = arith.constant 0 : i32
    return %c0_i32, %c0_i32_0 : i32, i32
  }
  func.func @transform_3(%arg0: i32) -> (i32, i32) {
    %c0_i32 = arith.constant 0 : i32
    %c0_i32_0 = arith.constant 0 : i32
    %c0_i32_1 = arith.constant 0 : i32
    return %c0_i32, %c0_i32_0 : i32, i32
  }
  func.func @transform_4(%arg0: i32) -> (i32, i32) {
    %c0_i32 = arith.constant 0 : i32
    %c0_i32_0 = arith.constant 0 : i32
    %c0_i32_1 = arith.constant 0 : i32
    return %c0_i32, %c0_i32_0 : i32, i32
  }
  func.func @transform_5(%arg0: i32) -> (i32, i32) {
    %c0_i32 = arith.constant 0 : i32
    %c0_i32_0 = arith.constant 0 : i32
    %c0_i32_1 = arith.constant 0 : i32
    return %c0_i32, %c0_i32_0 : i32, i32
  }
  func.func @transform_6(%arg0: i32) -> (i32, i32) {
    %c0_i32 = arith.constant 0 : i32
    %c0_i32_0 = arith.constant 0 : i32
    %c0_i32_1 = arith.constant 0 : i32
    return %c0_i32, %c0_i32_0 : i32, i32
  }
  func.func @transform_7(%arg0: i32) -> (i32, i32) {
    %c0_i32 = arith.constant 0 : i32
    %c0_i32_0 = arith.constant 0 : i32
    %c0_i32_1 = arith.constant 0 : i32
    return %c0_i32, %c0_i32_0 : i32, i32
  }
  func.func @transform_8(%arg0: i32) -> (i32, i32) {
    %c0_i32 = arith.constant 0 : i32
    %c0_i32_0 = arith.constant 0 : i32
    %c0_i32_1 = arith.constant 0 : i32
    return %c0_i32, %c0_i32_0 : i32, i32
  }
  func.func @transform_9(%arg0: i32) -> (i32, i32) {
    %c0_i32 = arith.constant 0 : i32
    %c0_i32_0 = arith.constant 0 : i32
    return %arg0, %c0_i32 : i32, i32
  }
}

</mosaic_0001>

<bundles_post_ra>
// kernel: tpu_custom_call.1
= control target key start
LH: loop header
LB: loop body
LE: loop exit
PB: predicated region body
PF: predicated region fallthrough
CT: control target
= control target key end

     0   :  { %vm86_vm0 = vcmask 523264   ;;  %s5367_s0 = inlined_call_operand.vmem [shape: f32[304,64], index: 0, kind: input, shape index: {}]   ;;  %s5368_s1 = inlined_call_operand.vmem [shape: f32[304,8], index: 1, kind: input, shape index: {}]   ;;  %s5369_s2 = inlined_call_operand.vmem [shape: f32[64,32], index: 2, kind: input, shape index: {}]   ;;  %s5370_s3 = inlined_call_operand.vmem [shape: f32[32,16], index: 3, kind: input, shape index: {}]   ;;  %s5371_s4 = inlined_call_operand.vmem [shape: f32[16,16], index: 4, kind: input, shape index: {}]   ;;  %s5372_s5 = inlined_call_operand.vmem [shape: f32[8,16], index: 5, kind: input, shape index: {}]   ;;  %s5373_s6 = inlined_call_operand.vmem [shape: f32[16,32], index: 6, kind: input, shape index: {}]   ;;  %s5374_s7 = inlined_call_operand.vmem [shape: f32[32,64], index: 7, kind: input, shape index: {}]   ;;  %s5375_s8 = inlined_call_operand.vmem [shape: f32[1,768], index: 8, kind: input, shape index: {}]   ;;  %s5376_s9 = inlined_call_operand.hbm [shape: f32[304,128], index: 9, kind: output, shape index: {}]  }
   0x1   :  { %v71_v0 = vld [vmem:[%s5369_s2] sm:$0xff]  ;;  %v72_v1 = vld [vmem:[%s5369_s2 + $0x8] sm:$0xff]  ;;  %v73_v2 = vld [vmem:[%s5369_s2 + $0x10] sm:$0xff] }
   0x2   :  { %v4034_v3 = vpack.c.bf16 %v72_v1, %v71_v0  ;;  %v74_v4 = vld [vmem:[%s5369_s2 + $0x18] sm:$0xff]  ;;  %v75_v6 = vld [vmem:[%s5369_s2 + $0x20] sm:$0xff]  ;;  %v76_v7 = vld [vmem:[%s5369_s2 + $0x28] sm:$0xff] }
   0x3   :  { %v4038_v5 = vpack.c.bf16 %v74_v4, %v73_v2  ;;  %v33_v8 = vld [vmem:[%s5367_s0] sm:$0xff]  ;;  %v4042_v9 = vpack.c.bf16 %v76_v7, %v75_v6  ;;  %v77_v10 = vld [vmem:[%s5369_s2 + $0x30] sm:$0xff]  ;;  %v78_v11 = vld [vmem:[%s5369_s2 + $0x38] sm:$0xff] }
   0x4   :  { %4035 = vmatprep.subr.bf16.mxu0 %v4034_v3  ;;  %3666 = vmatprep.mubr.msk.f32.mxu0 %vm86_vm0, %v33_v8  ;;  %v4046_v12 = vpack.c.bf16 %v78_v11, %v77_v10  ;;  %v494_v13 = vld [vmem:[%s5370_s3] sm:$0xff]  ;;  %v495_v14 = vld [vmem:[%s5370_s3 + $0x8] sm:$0xff] }
   0x5   :  { %4037 = vmatpush3.bf16.msra.mxu0 %v4034_v3  ;;  %v34_v15 = vld [vmem:[%s5367_s0 + $0x8] sm:$0xff]  ;;  %v4050_v16 = vpack.c.bf16 %v495_v14, %v494_v13 }
   0x6   :  { %4039 = vmatprep.subr.bf16.mxu0 %v4038_v5 }
   0x9   :  { %4041 = vmatpush3.bf16.msra.mxu0 %v4038_v5 }
   0xa   :  { %4043 = vmatprep.subr.bf16.mxu0 %v4042_v9 }
   0xd   :  { %4045 = vmatpush3.bf16.msra.mxu0 %v4042_v9 }
   0xe   :  { %4047 = vmatprep.subr.bf16.mxu0 %v4046_v12 }
  0x11   :  { %4049 = vmatpush3.bf16.msra.mxu0 %v4046_v12 }
  0x12   :  { %14 = vsyncpa [#allocation3], 0  ;;  %v35_v17 = vld [vmem:[%s5367_s0 + $0x10] sm:$0xff]  ;;  %4051 = vmatprep.subr.bf16.mxu1 %v4050_v16  ;;  %v36_v18 = vld [vmem:[%s5367_s0 + $0x18] sm:$0xff]  ;;  %vm505_vm1 = vcmask 261120   ;;  %vm922_vm2 = vcmask 130048  }
  0x13   :  { %4053 = vmatpush3.bf16.msra.mxu1 %v4050_v16  ;;  %v37_v19 = vld [vmem:[%s5367_s0 + $0x20] sm:$0xff]  ;;  %v38_v20 = vld [vmem:[%s5367_s0 + $0x28] sm:$0xff]  ;;  %v39_v21 = vld [vmem:[%s5367_s0 + $0x30] sm:$0xff]  ;;  %vm1680_vm3 = vcmask 64512   ;;  %s4182_s21 = smov 16   ;;  %vm3074_vm4 = vcmask 654336  }
  0x14   :  { %3667 = vmatmul.mubr.msk.f32.vlgmr.msra.gmra.mrb[0].mxu0 %vm86_vm0, %v34_v15  ;;  %v40_v22 = vld [vmem:[%s5367_s0 + $0x38] sm:$0xff]  ;;  %v41_v23 = vld [vmem:[%s5367_s0 + $0x40] sm:$0xff]  ;;  %v42_v24 = vld [vmem:[%s5367_s0 + $0x48] sm:$0xff] }
  0x15   :  { %3669 = vmatprep.mubr.msk.f32.mxu0 %vm86_vm0, %v35_v17  ;;  %v43_v25 = vld [vmem:[%s5367_s0 + $0x50] sm:$0xff]  ;;  %v44_v26 = vld [vmem:[%s5367_s0 + $0x58] sm:$0xff]  ;;  %v45_v27 = vld [vmem:[%s5367_s0 + $0x60] sm:$0xff] }
  0x16   :  { %v46_v28 = vld [vmem:[%s5367_s0 + $0x68] sm:$0xff]  ;;  %v47_v29 = vld [vmem:[%s5367_s0 + $0x70] sm:$0xff]  ;;  %v48_v30 = vld [vmem:[%s5367_s0 + $0x78] sm:$0xff] }
  0x17   :  { %v49_v31 = vld [vmem:[%s5367_s0 + $0x80] sm:$0xff]  ;;  %v50_v32 = vld [vmem:[%s5367_s0 + $0x88] sm:$0xff]  ;;  %v51_v33 = vld [vmem:[%s5367_s0 + $0x90] sm:$0xff] }
  0x18   :  { %3670 = vmatmul.mubr.msk.f32.gmra.mrb[2].mxu0 %vm86_vm0, %v36_v18  ;;  %v52_v34 = vld [vmem:[%s5367_s0 + $0x98] sm:$0xff]  ;;  %v53_v35 = vld [vmem:[%s5367_s0 + $0xa0] sm:$0xff]  ;;  %v54_v36 = vld [vmem:[%s5367_s0 + $0xa8] sm:$0xff] }
  0x19   :  { %3672 = vmatprep.mubr.msk.f32.mxu0 %vm86_vm0, %v37_v19  ;;  %v55_v37 = vld [vmem:[%s5367_s0 + $0xb0] sm:$0xff]  ;;  %v56_v38 = vld [vmem:[%s5367_s0 + $0xb8] sm:$0xff]  ;;  %v57_v39 = vld [vmem:[%s5367_s0 + $0xc0] sm:$0xff] }
  0x1a   :  { %v58_v40 = vld [vmem:[%s5367_s0 + $0xc8] sm:$0xff]  ;;  %v59_v41 = vld [vmem:[%s5367_s0 + $0xd0] sm:$0xff]  ;;  %v60_v42 = vld [vmem:[%s5367_s0 + $0xd8] sm:$0xff] }
  0x1b   :  { %v61_v43 = vld [vmem:[%s5367_s0 + $0xe0] sm:$0xff]  ;;  %v62_v44 = vld [vmem:[%s5367_s0 + $0xe8] sm:$0xff]  ;;  %v63_v45 = vld [vmem:[%s5367_s0 + $0xf0] sm:$0xff] }
  0x1c   :  { %3673 = vmatmul.mubr.msk.f32.gmra.mrb[4].mxu0 %vm86_vm0, %v38_v20  ;;  %v64_v46 = vld [vmem:[%s5367_s0 + $0xf8] sm:$0xff]  ;;  %v65_v47 = vld [vmem:[%s5367_s0 + $0x100] sm:$0xff]  ;;  %v66_v48 = vld [vmem:[%s5367_s0 + $0x108] sm:$0xff] }
  0x1d   :  { %3675 = vmatprep.mubr.msk.f32.mxu0 %vm86_vm0, %v39_v21  ;;  %v67_v49 = vld [vmem:[%s5367_s0 + $0x110] sm:$0xff]  ;;  %v68_v50 = vld [vmem:[%s5367_s0 + $0x118] sm:$0xff]  ;;  %v69_v51 = vld [vmem:[%s5367_s0 + $0x120] sm:$0xff] }
  0x1e   :  { %v70_v52 = vld [vmem:[%s5367_s0 + $0x128] sm:$0xff]  ;;  %v496_v53 = vld [vmem:[%s5370_s3 + $0x10] sm:$0xff]  ;;  %v497_v54 = vld [vmem:[%s5370_s3 + $0x18] sm:$0xff] }
  0x1f   :  { %v4054_v55 = vpack.c.bf16 %v497_v54, %v496_v53  ;;  %v913_v56 = vld [vmem:[%s5371_s4] sm:$0xff]  ;;  %v914_v57 = vld [vmem:[%s5371_s4 + $0x8] sm:$0xff] }
  0x20   :  { %3676 = vmatmul.mubr.msk.f32.gmra.mrb[6].mxu0 %vm86_vm0, %v40_v22  ;;  %v4058_v58 = vpack.c.bf16 %v914_v57, %v913_v56  ;;  %v4433_v59 = vld [vmem:[%s5375_s8] ss:$0 sm:$0xff] }
  0x21   :  { %3678 = vmatprep.mubr.msk.f32.mxu0 %vm86_vm0, %v41_v23  ;;  %4055 = vmatprep.subr.bf16.mxu1 %v4054_v55 }
  0x22   :  { %4057 = vmatpush3.bf16.msra.mxu1 %v4054_v55 }
  0x23   :  { %4059 = vmatprep.subr.bf16.mxu1 %v4058_v58 }
  0x24   :  { %3679 = vmatmul.mubr.msk.f32.gmra.mrb[8].mxu0 %vm86_vm0, %v42_v24 }
  0x25   :  { %3681 = vmatprep.mubr.msk.f32.mxu0 %vm86_vm0, %v43_v25 }
  0x28   :  { %3682 = vmatmul.mubr.msk.f32.gmra.mrb[10].mxu0 %vm86_vm0, %v44_v26 }
  0x29   :  { %3684 = vmatprep.mubr.msk.f32.mxu0 %vm86_vm0, %v45_v27 }
  0x2c   :  { %3685 = vmatmul.mubr.msk.f32.gmra.mrb[12].mxu0 %vm86_vm0, %v46_v28 }
  0x2d   :  { %3687 = vmatprep.mubr.msk.f32.mxu0 %vm86_vm0, %v47_v29 }
  0x30   :  { %3688 = vmatmul.mubr.msk.f32.gmra.mrb[14].mxu0 %vm86_vm0, %v48_v30 }
  0x31   :  { %3690 = vmatprep.mubr.msk.f32.mxu0 %vm86_vm0, %v49_v31 }
  0x34   :  { %3691 = vmatmul.mubr.msk.f32.gmra.mrb[16].mxu0 %vm86_vm0, %v50_v32 }
  0x35   :  { %3693 = vmatprep.mubr.msk.f32.mxu0 %vm86_vm0, %v51_v33 }
  0x38   :  { %3694 = vmatmul.mubr.msk.f32.gmra.mrb[18].mxu0 %vm86_vm0, %v52_v34 }
  0x39   :  { %3696 = vmatprep.mubr.msk.f32.mxu0 %vm86_vm0, %v53_v35 }
  0x3c   :  { %3697 = vmatmul.mubr.msk.f32.gmra.mrb[20].mxu0 %vm86_vm0, %v54_v36 }
  0x3d   :  { %3699 = vmatprep.mubr.msk.f32.mxu0 %vm86_vm0, %v55_v37 }
  0x40   :  { %3700 = vmatmul.mubr.msk.f32.gmra.mrb[22].mxu0 %vm86_vm0, %v56_v38 }
  0x41   :  { %3702 = vmatprep.mubr.msk.f32.mxu0 %vm86_vm0, %v57_v39 }
  0x44   :  { %3703 = vmatmul.mubr.msk.f32.gmra.mrb[24].mxu0 %vm86_vm0, %v58_v40 }
  0x45   :  { %3705 = vmatprep.mubr.msk.f32.mxu0 %vm86_vm0, %v59_v41 }
  0x48   :  { %3706 = vmatmul.mubr.msk.f32.gmra.mrb[26].mxu0 %vm86_vm0, %v60_v42 }
  0x49   :  { %3708 = vmatprep.mubr.msk.f32.mxu0 %vm86_vm0, %v61_v43 }
  0x4c   :  { %3709 = vmatmul.mubr.msk.f32.gmra.mrb[28].mxu0 %vm86_vm0, %v62_v44 }
  0x4d   :  { %3711 = vmatprep.mubr.msk.f32.mxu0 %vm86_vm0, %v63_v45 }
  0x50   :  { %3712 = vmatmul.mubr.msk.f32.gmra.mrb[30].mxu0 %vm86_vm0, %v64_v46 }
  0x51   :  { %3714 = vmatprep.mubr.msk.f32.mxu0 %vm86_vm0, %v65_v47 }
  0x54   :  { %3715 = vmatmul.mubr.msk.f32.gmra.mrb[32].mxu0 %vm86_vm0, %v66_v48 }
  0x55   :  { %3717 = vmatprep.mubr.msk.f32.mxu0 %vm86_vm0, %v67_v49 }
  0x58   :  { %3718 = vmatmul.mubr.msk.f32.gmra.mrb[34].mxu0 %vm86_vm0, %v68_v50 }
  0x59   :  { %3720 = vmatprep.mubr.msk.f32.mxu0 %vm86_vm0, %v69_v51 }
  0x5c   :  { %3721 = vmatmul.mubr.msk.f32.gmra.mrb[36].mxu0 %vm86_vm0, %v70_v52 }
  0xe7   :  { %v3668_v60 = vpop.f32.mrb[0].mxu0 }
  0xe8   :  { %v273_v61 = vadd.f32 %v3668_v60, %v4433_v59  ;;  %v267_v62 = vpop.f32.mrb[1].mxu0 }
  0xe9   :  { %v268_v63 = vadd.f32 %v4433_v59, %v267_v62 }
  0xea   :  { %v457_v2 = vmax.f32 %v273_v61, 0.0 }
  0xeb   :  { %v456_v0 = vmax.f32 %v268_v63, 0.0  ;;  %v3671_v1 = vpop.f32.mrb[2].mxu0 }
  0xec   :  { %v283_v3 = vadd.f32 %v3671_v1, %v4433_v59  ;;  %v277_v4 = vpop.f32.mrb[3].mxu0 }
  0xed   :  { %v278_v5 = vadd.f32 %v4433_v59, %v277_v4  ;;  %3731 = vmatprep.mubr.msk.f32.mxu1 %vm505_vm1, %v456_v0 }
  0xee   :  { %3732 = vmatmul.mubr.msk.f32.vlgmr.msra.gmra.mrb[0].mxu1 %vm505_vm1, %v457_v2  ;;  %v459_v8 = vmax.f32 %v283_v3, 0.0 }
  0xef   :  { %v458_v6 = vmax.f32 %v278_v5, 0.0  ;;  %v3674_v7 = vpop.f32.mrb[4].mxu0  ;;  %4061 = vmatpush3.bf16.msra.mxu1 %v4058_v58 }
  0xf0   :  { %v293_v9 = vadd.f32 %v3674_v7, %v4433_v59  ;;  %v287_v10 = vpop.f32.mrb[5].mxu0 }
  0xf1   :  { %v288_v11 = vadd.f32 %v4433_v59, %v287_v10  ;;  %3734 = vmatprep.mubr.msk.f32.mxu1 %vm505_vm1, %v458_v6 }
  0xf2   :  { %v461_v12 = vmax.f32 %v293_v9, 0.0  ;;  %3735 = vmatmul.mubr.msk.f32.gmra.mrb[2].mxu1 %vm505_vm1, %v459_v8 }
  0xf3   :  { %v460_v13 = vmax.f32 %v288_v11, 0.0  ;;  %v3677_v14 = vpop.f32.mrb[6].mxu0 }
  0xf4   :  { %v303_v15 = vadd.f32 %v3677_v14, %v4433_v59  ;;  %v297_v16 = vpop.f32.mrb[7].mxu0 }
  0xf5   :  { %v298_v17 = vadd.f32 %v4433_v59, %v297_v16  ;;  %3737 = vmatprep.mubr.msk.f32.mxu1 %vm505_vm1, %v460_v13 }
  0xf6   :  { %v463_v18 = vmax.f32 %v303_v15, 0.0  ;;  %3738 = vmatmul.mubr.msk.f32.gmra.mrb[4].mxu1 %vm505_vm1, %v461_v12 }
  0xf7   :  { %v462_v19 = vmax.f32 %v298_v17, 0.0  ;;  %v3680_v20 = vpop.f32.mrb[8].mxu0 }
  0xf8   :  { %v313_v21 = vadd.f32 %v3680_v20, %v4433_v59  ;;  %v307_v22 = vpop.f32.mrb[9].mxu0 }
  0xf9   :  { %v308_v23 = vadd.f32 %v4433_v59, %v307_v22  ;;  %3740 = vmatprep.mubr.msk.f32.mxu1 %vm505_vm1, %v462_v19 }
  0xfa   :  { %v465_v24 = vmax.f32 %v313_v21, 0.0  ;;  %3741 = vmatmul.mubr.msk.f32.gmra.mrb[6].mxu1 %vm505_vm1, %v463_v18 }
  0xfb   :  { %v464_v25 = vmax.f32 %v308_v23, 0.0  ;;  %v3683_v26 = vpop.f32.mrb[10].mxu0 }
  0xfc   :  { %v323_v27 = vadd.f32 %v3683_v26, %v4433_v59  ;;  %v317_v28 = vpop.f32.mrb[11].mxu0 }
  0xfd   :  { %v318_v29 = vadd.f32 %v4433_v59, %v317_v28  ;;  %3743 = vmatprep.mubr.msk.f32.mxu1 %vm505_vm1, %v464_v25 }
  0xfe   :  { %v467_v30 = vmax.f32 %v323_v27, 0.0  ;;  %3744 = vmatmul.mubr.msk.f32.gmra.mrb[8].mxu1 %vm505_vm1, %v465_v24 }
  0xff   :  { %v466_v31 = vmax.f32 %v318_v29, 0.0  ;;  %v3686_v32 = vpop.f32.mrb[12].mxu0 }
 0x100   :  { %v333_v33 = vadd.f32 %v3686_v32, %v4433_v59  ;;  %v327_v34 = vpop.f32.mrb[13].mxu0 }
 0x101   :  { %v328_v35 = vadd.f32 %v4433_v59, %v327_v34  ;;  %3746 = vmatprep.mubr.msk.f32.mxu1 %vm505_vm1, %v466_v31 }
 0x102   :  { %v469_v36 = vmax.f32 %v333_v33, 0.0  ;;  %3747 = vmatmul.mubr.msk.f32.gmra.mrb[10].mxu1 %vm505_vm1, %v467_v30 }
 0x103   :  { %v468_v37 = vmax.f32 %v328_v35, 0.0  ;;  %v3689_v38 = vpop.f32.mrb[14].mxu0 }
 0x104   :  { %v343_v39 = vadd.f32 %v3689_v38, %v4433_v59  ;;  %v337_v40 = vpop.f32.mrb[15].mxu0 }
 0x105   :  { %v338_v41 = vadd.f32 %v4433_v59, %v337_v40  ;;  %3749 = vmatprep.mubr.msk.f32.mxu1 %vm505_vm1, %v468_v37 }
 0x106   :  { %v471_v42 = vmax.f32 %v343_v39, 0.0  ;;  %3750 = vmatmul.mubr.msk.f32.gmra.mrb[12].mxu1 %vm505_vm1, %v469_v36 }
 0x107   :  { %v470_v43 = vmax.f32 %v338_v41, 0.0  ;;  %v3692_v44 = vpop.f32.mrb[16].mxu0 }
 0x108   :  { %v353_v45 = vadd.f32 %v3692_v44, %v4433_v59  ;;  %v347_v46 = vpop.f32.mrb[17].mxu0 }
 0x109   :  { %v348_v47 = vadd.f32 %v4433_v59, %v347_v46  ;;  %3752 = vmatprep.mubr.msk.f32.mxu1 %vm505_vm1, %v470_v43 }
 0x10a   :  { %v473_v48 = vmax.f32 %v353_v45, 0.0  ;;  %3753 = vmatmul.mubr.msk.f32.gmra.mrb[14].mxu1 %vm505_vm1, %v471_v42 }
 0x10b   :  { %v472_v49 = vmax.f32 %v348_v47, 0.0  ;;  %v3695_v50 = vpop.f32.mrb[18].mxu0  ;;  %v4514_v47 = vld [vmem:[%s5375_s8 + $0x1] ss:$0 sm:$0xff] }
 0x10c   :  { %v363_v51 = vadd.f32 %v3695_v50, %v4433_v59  ;;  %v357_v52 = vpop.f32.mrb[19].mxu0 }
 0x10d   :  { %v358_v53 = vadd.f32 %v4433_v59, %v357_v52  ;;  %3755 = vmatprep.mubr.msk.f32.mxu1 %vm505_vm1, %v472_v49 }
 0x10e   :  { %v475_v54 = vmax.f32 %v363_v51, 0.0  ;;  %3756 = vmatmul.mubr.msk.f32.gmra.mrb[16].mxu1 %vm505_vm1, %v473_v48 }
 0x10f   :  { %v474_v55 = vmax.f32 %v358_v53, 0.0  ;;  %v3698_v56 = vpop.f32.mrb[20].mxu0 }
 0x110   :  { %v373_v57 = vadd.f32 %v3698_v56, %v4433_v59  ;;  %v367_v58 = vpop.f32.mrb[21].mxu0 }
 0x111   :  { %v368_v60 = vadd.f32 %v4433_v59, %v367_v58  ;;  %3758 = vmatprep.mubr.msk.f32.mxu1 %vm505_vm1, %v474_v55 }
 0x112   :  { %v477_v61 = vmax.f32 %v373_v57, 0.0  ;;  %3759 = vmatmul.mubr.msk.f32.gmra.mrb[18].mxu1 %vm505_vm1, %v475_v54 }
 0x113   :  { %v476_v62 = vmax.f32 %v368_v60, 0.0  ;;  %v3701_v63 = vpop.f32.mrb[22].mxu0 }
 0x114   :  { %v383_v0 = vadd.f32 %v3701_v63, %v4433_v59  ;;  %v377_v1 = vpop.f32.mrb[23].mxu0 }
 0x115   :  { %v378_v2 = vadd.f32 %v4433_v59, %v377_v1  ;;  %3761 = vmatprep.mubr.msk.f32.mxu1 %vm505_vm1, %v476_v62 }
 0x116   :  { %v479_v3 = vmax.f32 %v383_v0, 0.0  ;;  %3762 = vmatmul.mubr.msk.f32.gmra.mrb[20].mxu1 %vm505_vm1, %v477_v61 }
 0x117   :  { %v478_v4 = vmax.f32 %v378_v2, 0.0  ;;  %v3704_v5 = vpop.f32.mrb[24].mxu0 }
 0x118   :  { %v393_v6 = vadd.f32 %v3704_v5, %v4433_v59  ;;  %v387_v7 = vpop.f32.mrb[25].mxu0 }
 0x119   :  { %v388_v8 = vadd.f32 %v4433_v59, %v387_v7  ;;  %3764 = vmatprep.mubr.msk.f32.mxu1 %vm505_vm1, %v478_v4 }
 0x11a   :  { %v481_v9 = vmax.f32 %v393_v6, 0.0  ;;  %3765 = vmatmul.mubr.msk.f32.gmra.mrb[22].mxu1 %vm505_vm1, %v479_v3 }
 0x11b   :  { %v480_v10 = vmax.f32 %v388_v8, 0.0  ;;  %v3707_v11 = vpop.f32.mrb[26].mxu0 }
 0x11c   :  { %v403_v12 = vadd.f32 %v3707_v11, %v4433_v59  ;;  %v397_v13 = vpop.f32.mrb[27].mxu0 }
 0x11d   :  { %v398_v14 = vadd.f32 %v4433_v59, %v397_v13  ;;  %3767 = vmatprep.mubr.msk.f32.mxu1 %vm505_vm1, %v480_v10 }
 0x11e   :  { %v483_v15 = vmax.f32 %v403_v12, 0.0  ;;  %3768 = vmatmul.mubr.msk.f32.gmra.mrb[24].mxu1 %vm505_vm1, %v481_v9 }
 0x11f   :  { %v482_v16 = vmax.f32 %v398_v14, 0.0  ;;  %v3710_v17 = vpop.f32.mrb[28].mxu0 }
 0x120   :  { %v413_v18 = vadd.f32 %v3710_v17, %v4433_v59  ;;  %v407_v19 = vpop.f32.mrb[29].mxu0 }
 0x121   :  { %v408_v20 = vadd.f32 %v4433_v59, %v407_v19  ;;  %3770 = vmatprep.mubr.msk.f32.mxu1 %vm505_vm1, %v482_v16 }
 0x122   :  { %v485_v21 = vmax.f32 %v413_v18, 0.0  ;;  %3771 = vmatmul.mubr.msk.f32.gmra.mrb[26].mxu1 %vm505_vm1, %v483_v15 }
 0x123   :  { %v484_v22 = vmax.f32 %v408_v20, 0.0  ;;  %v3713_v23 = vpop.f32.mrb[30].mxu0 }
 0x124   :  { %v423_v24 = vadd.f32 %v3713_v23, %v4433_v59  ;;  %v417_v25 = vpop.f32.mrb[31].mxu0 }
 0x125   :  { %v418_v26 = vadd.f32 %v4433_v59, %v417_v25  ;;  %3773 = vmatprep.mubr.msk.f32.mxu1 %vm505_vm1, %v484_v22 }
 0x126   :  { %v487_v27 = vmax.f32 %v423_v24, 0.0  ;;  %3774 = vmatmul.mubr.msk.f32.gmra.mrb[28].mxu1 %vm505_vm1, %v485_v21 }
 0x127   :  { %v486_v28 = vmax.f32 %v418_v26, 0.0  ;;  %v3716_v29 = vpop.f32.mrb[32].mxu0 }
 0x128   :  { %v433_v30 = vadd.f32 %v3716_v29, %v4433_v59  ;;  %v427_v31 = vpop.f32.mrb[33].mxu0 }
 0x129   :  { %v428_v32 = vadd.f32 %v4433_v59, %v427_v31  ;;  %3776 = vmatprep.mubr.msk.f32.mxu1 %vm505_vm1, %v486_v28 }
 0x12a   :  { %v489_v33 = vmax.f32 %v433_v30, 0.0  ;;  %3777 = vmatmul.mubr.msk.f32.gmra.mrb[30].mxu1 %vm505_vm1, %v487_v27 }
 0x12b   :  { %v488_v34 = vmax.f32 %v428_v32, 0.0  ;;  %v3719_v35 = vpop.f32.mrb[34].mxu0 }
 0x12c   :  { %v443_v36 = vadd.f32 %v3719_v35, %v4433_v59  ;;  %v437_v37 = vpop.f32.mrb[35].mxu0 }
 0x12d   :  { %v438_v38 = vadd.f32 %v4433_v59, %v437_v37  ;;  %3779 = vmatprep.mubr.msk.f32.mxu1 %vm505_vm1, %v488_v34 }
 0x12e   :  { %v491_v39 = vmax.f32 %v443_v36, 0.0  ;;  %3780 = vmatmul.mubr.msk.f32.gmra.mrb[32].mxu1 %vm505_vm1, %v489_v33 }
 0x12f   :  { %v490_v40 = vmax.f32 %v438_v38, 0.0  ;;  %v3722_v41 = vpop.f32.mrb[36].mxu0 }
 0x130   :  { %v453_v42 = vadd.f32 %v3722_v41, %v4433_v59  ;;  %v447_v43 = vpop.f32.mrb[37].mxu0 }
 0x131   :  { %v448_v44 = vadd.f32 %v4433_v59, %v447_v43  ;;  %3782 = vmatprep.mubr.msk.f32.mxu1 %vm505_vm1, %v490_v40 }
 0x132   :  { %v493_v45 = vmax.f32 %v453_v42, 0.0  ;;  %3783 = vmatmul.mubr.msk.f32.gmra.mrb[34].mxu1 %vm505_vm1, %v491_v39 }
 0x133   :  { %v492_v46 = vmax.f32 %v448_v44, 0.0 }
 0x135   :  { %3785 = vmatprep.mubr.msk.f32.mxu1 %vm505_vm1, %v492_v46 }
 0x136   :  { %3786 = vmatmul.mubr.msk.f32.gmra.mrb[36].mxu1 %vm505_vm1, %v493_v45 }
 0x1c1   :  { %v3733_v48 = vpop.f32.mrb[0].mxu1 }
 0x1c2   :  { %v692_v49 = vadd.f32 %v3733_v48, %v4514_v47  ;;  %v686_v50 = vpop.f32.mrb[1].mxu1 }
 0x1c3   :  { %v687_v59 = vadd.f32 %v4514_v47, %v686_v50 }
 0x1c4   :  { %v876_v53 = vmax.f32 %v692_v49, 0.0 }
 0x1c5   :  { %v875_v51 = vmax.f32 %v687_v59, 0.0  ;;  %v3736_v52 = vpop.f32.mrb[2].mxu1 }
 0x1c6   :  { %v702_v54 = vadd.f32 %v3736_v52, %v4514_v47  ;;  %v696_v55 = vpop.f32.mrb[3].mxu1 }
 0x1c7   :  { %v697_v56 = vadd.f32 %v4514_v47, %v696_v55  ;;  %3792 = vmatprep.mubr.msk.f32.mxu1 %vm922_vm2, %v875_v51 }
 0x1c8   :  { %3793 = vmatmul.mubr.msk.f32.vlgmr.msra.gmra.mrb[38].mxu1 %vm922_vm2, %v876_v53  ;;  %v878_v60 = vmax.f32 %v702_v54, 0.0 }
 0x1c9   :  { %v877_v57 = vmax.f32 %v697_v56, 0.0  ;;  %v3739_v58 = vpop.f32.mrb[4].mxu1 }
 0x1ca   :  { %v712_v61 = vadd.f32 %v3739_v58, %v4514_v47  ;;  %v706_v62 = vpop.f32.mrb[5].mxu1 }
 0x1cb   :  { %v707_v63 = vadd.f32 %v4514_v47, %v706_v62  ;;  %3795 = vmatprep.mubr.msk.f32.mxu1 %vm922_vm2, %v877_v57 }
 0x1cc   :  { %v880_v0 = vmax.f32 %v712_v61, 0.0  ;;  %3796 = vmatmul.mubr.msk.f32.gmra.mrb[40].mxu1 %vm922_vm2, %v878_v60 }
 0x1cd   :  { %v879_v1 = vmax.f32 %v707_v63, 0.0  ;;  %v3742_v2 = vpop.f32.mrb[6].mxu1 }
 0x1ce   :  { %v722_v3 = vadd.f32 %v3742_v2, %v4514_v47  ;;  %v716_v4 = vpop.f32.mrb[7].mxu1 }
 0x1cf   :  { %v717_v5 = vadd.f32 %v4514_v47, %v716_v4  ;;  %3798 = vmatprep.mubr.msk.f32.mxu1 %vm922_vm2, %v879_v1 }
 0x1d0   :  { %v882_v6 = vmax.f32 %v722_v3, 0.0  ;;  %3799 = vmatmul.mubr.msk.f32.gmra.mrb[42].mxu1 %vm922_vm2, %v880_v0 }
 0x1d1   :  { %v881_v7 = vmax.f32 %v717_v5, 0.0  ;;  %v3745_v8 = vpop.f32.mrb[8].mxu1 }
 0x1d2   :  { %v732_v9 = vadd.f32 %v3745_v8, %v4514_v47  ;;  %v726_v10 = vpop.f32.mrb[9].mxu1 }
 0x1d3   :  { %v727_v11 = vadd.f32 %v4514_v47, %v726_v10  ;;  %3801 = vmatprep.mubr.msk.f32.mxu1 %vm922_vm2, %v881_v7 }
 0x1d4   :  { %v884_v12 = vmax.f32 %v732_v9, 0.0  ;;  %3802 = vmatmul.mubr.msk.f32.gmra.mrb[44].mxu1 %vm922_vm2, %v882_v6 }
 0x1d5   :  { %v883_v13 = vmax.f32 %v727_v11, 0.0  ;;  %v3748_v14 = vpop.f32.mrb[10].mxu1 }
 0x1d6   :  { %v742_v15 = vadd.f32 %v3748_v14, %v4514_v47  ;;  %v736_v16 = vpop.f32.mrb[11].mxu1 }
 0x1d7   :  { %v737_v17 = vadd.f32 %v4514_v47, %v736_v16  ;;  %3804 = vmatprep.mubr.msk.f32.mxu1 %vm922_vm2, %v883_v13 }
 0x1d8   :  { %v886_v18 = vmax.f32 %v742_v15, 0.0  ;;  %3805 = vmatmul.mubr.msk.f32.gmra.mrb[46].mxu1 %vm922_vm2, %v884_v12 }
 0x1d9   :  { %v885_v19 = vmax.f32 %v737_v17, 0.0  ;;  %v3751_v20 = vpop.f32.mrb[12].mxu1 }
 0x1da   :  { %v752_v21 = vadd.f32 %v3751_v20, %v4514_v47  ;;  %v746_v22 = vpop.f32.mrb[13].mxu1 }
 0x1db   :  { %v747_v23 = vadd.f32 %v4514_v47, %v746_v22  ;;  %3807 = vmatprep.mubr.msk.f32.mxu1 %vm922_vm2, %v885_v19 }
 0x1dc   :  { %v888_v24 = vmax.f32 %v752_v21, 0.0  ;;  %3808 = vmatmul.mubr.msk.f32.gmra.mrb[48].mxu1 %vm922_vm2, %v886_v18 }
 0x1dd   :  { %v887_v25 = vmax.f32 %v747_v23, 0.0  ;;  %v3754_v26 = vpop.f32.mrb[14].mxu1 }
 0x1de   :  { %v762_v27 = vadd.f32 %v3754_v26, %v4514_v47  ;;  %v756_v28 = vpop.f32.mrb[15].mxu1 }
 0x1df   :  { %v757_v29 = vadd.f32 %v4514_v47, %v756_v28  ;;  %3810 = vmatprep.mubr.msk.f32.mxu1 %vm922_vm2, %v887_v25 }
 0x1e0   :  { %v890_v30 = vmax.f32 %v762_v27, 0.0  ;;  %3811 = vmatmul.mubr.msk.f32.gmra.mrb[50].mxu1 %vm922_vm2, %v888_v24 }
 0x1e1   :  { %v889_v31 = vmax.f32 %v757_v29, 0.0  ;;  %v3757_v32 = vpop.f32.mrb[16].mxu1 }
 0x1e2   :  { %v772_v33 = vadd.f32 %v3757_v32, %v4514_v47  ;;  %v766_v34 = vpop.f32.mrb[17].mxu1 }
 0x1e3   :  { %v767_v35 = vadd.f32 %v4514_v47, %v766_v34  ;;  %3813 = vmatprep.mubr.msk.f32.mxu1 %vm922_vm2, %v889_v31 }
 0x1e4   :  { %v892_v36 = vmax.f32 %v772_v33, 0.0  ;;  %3814 = vmatmul.mubr.msk.f32.gmra.mrb[52].mxu1 %vm922_vm2, %v890_v30 }
 0x1e5   :  { %v891_v37 = vmax.f32 %v767_v35, 0.0  ;;  %v3760_v38 = vpop.f32.mrb[18].mxu1  ;;  %v1672_v35 = vld [vmem:[%s5372_s5] sm:$0xff]  ;;  %s4181_s5 = smov 120  }
 0x1e6   :  { %v782_v39 = vadd.f32 %v3760_v38, %v4514_v47  ;;  %v776_v40 = vpop.f32.mrb[19].mxu1  ;;  %3849 = vmatprep.subr.mxu0 %v1672_v35  ;;  %4074 = vmatprep.subr.mxu1 %v1672_v35 }
 0x1e7   :  { %v777_v41 = vadd.f32 %v4514_v47, %v776_v40  ;;  %3816 = vmatprep.mubr.msk.f32.mxu1 %vm922_vm2, %v891_v37  ;;  %3850 = vmatpush3.msra.mxu0 %v1672_v35 }
 0x1e8   :  { %v894_v42 = vmax.f32 %v782_v39, 0.0  ;;  %3817 = vmatmul.mubr.msk.f32.gmra.mrb[54].mxu1 %vm922_vm2, %v892_v36 }
 0x1e9   :  { %v893_v43 = vmax.f32 %v777_v41, 0.0  ;;  %v3763_v44 = vpop.f32.mrb[20].mxu1  ;;  %4075 = vmatpush3.msra.mxu1 %v1672_v35 }
 0x1ea   :  { %v792_v45 = vadd.f32 %v3763_v44, %v4514_v47  ;;  %v786_v46 = vpop.f32.mrb[21].mxu1 }
 0x1eb   :  { %v787_v48 = vadd.f32 %v4514_v47, %v786_v46  ;;  %3819 = vmatprep.mubr.msk.f32.mxu1 %vm922_vm2, %v893_v43 }
 0x1ec   :  { %v896_v49 = vmax.f32 %v792_v45, 0.0  ;;  %3820 = vmatmul.mubr.msk.f32.gmra.mrb[56].mxu1 %vm922_vm2, %v894_v42 }
 0x1ed   :  { %v895_v50 = vmax.f32 %v787_v48, 0.0  ;;  %v3766_v59 = vpop.f32.mrb[22].mxu1 }
 0x1ee   :  { %v802_v51 = vadd.f32 %v3766_v59, %v4514_v47  ;;  %v796_v52 = vpop.f32.mrb[23].mxu1 }
 0x1ef   :  { %v797_v53 = vadd.f32 %v4514_v47, %v796_v52  ;;  %3822 = vmatprep.mubr.msk.f32.mxu1 %vm922_vm2, %v895_v50 }
 0x1f0   :  { %v898_v54 = vmax.f32 %v802_v51, 0.0  ;;  %3823 = vmatmul.mubr.msk.f32.gmra.mrb[58].mxu1 %vm922_vm2, %v896_v49 }
 0x1f1   :  { %v897_v55 = vmax.f32 %v797_v53, 0.0  ;;  %v3769_v56 = vpop.f32.mrb[24].mxu1 }
 0x1f2   :  { %v812_v57 = vadd.f32 %v3769_v56, %v4514_v47  ;;  %v806_v58 = vpop.f32.mrb[25].mxu1 }
 0x1f3   :  { %v807_v60 = vadd.f32 %v4514_v47, %v806_v58  ;;  %3825 = vmatprep.mubr.msk.f32.mxu1 %vm922_vm2, %v897_v55 }
 0x1f4   :  { %v900_v61 = vmax.f32 %v812_v57, 0.0  ;;  %3826 = vmatmul.mubr.msk.f32.gmra.mrb[60].mxu1 %vm922_vm2, %v898_v54 }
 0x1f5   :  { %v899_v62 = vmax.f32 %v807_v60, 0.0  ;;  %v3772_v63 = vpop.f32.mrb[26].mxu1 }
 0x1f6   :  { %v822_v0 = vadd.f32 %v3772_v63, %v4514_v47  ;;  %v816_v1 = vpop.f32.mrb[27].mxu1 }
 0x1f7   :  { %v817_v2 = vadd.f32 %v4514_v47, %v816_v1  ;;  %3828 = vmatprep.mubr.msk.f32.mxu1 %vm922_vm2, %v899_v62 }
 0x1f8   :  { %v902_v3 = vmax.f32 %v822_v0, 0.0  ;;  %3829 = vmatmul.mubr.msk.f32.gmra.mrb[62].mxu1 %vm922_vm2, %v900_v61 }
 0x1f9   :  { %v901_v4 = vmax.f32 %v817_v2, 0.0  ;;  %v3775_v5 = vpop.f32.mrb[28].mxu1 }
 0x1fa   :  { %v832_v6 = vadd.f32 %v3775_v5, %v4514_v47  ;;  %v826_v7 = vpop.f32.mrb[29].mxu1 }
 0x1fb   :  { %v827_v8 = vadd.f32 %v4514_v47, %v826_v7  ;;  %3831 = vmatprep.mubr.msk.f32.mxu1 %vm922_vm2, %v901_v4 }
 0x1fc   :  { %v904_v9 = vmax.f32 %v832_v6, 0.0  ;;  %3832 = vmatmul.mubr.msk.f32.gmra.mrb[64].mxu1 %vm922_vm2, %v902_v3 }
 0x1fd   :  { %v903_v10 = vmax.f32 %v827_v8, 0.0  ;;  %v3778_v11 = vpop.f32.mrb[30].mxu1 }
 0x1fe   :  { %v842_v12 = vadd.f32 %v3778_v11, %v4514_v47  ;;  %v836_v13 = vpop.f32.mrb[31].mxu1 }
 0x1ff   :  { %v837_v14 = vadd.f32 %v4514_v47, %v836_v13  ;;  %3834 = vmatprep.mubr.msk.f32.mxu1 %vm922_vm2, %v903_v10 }
 0x200   :  { %v906_v15 = vmax.f32 %v842_v12, 0.0  ;;  %3835 = vmatmul.mubr.msk.f32.gmra.mrb[66].mxu1 %vm922_vm2, %v904_v9 }
 0x201   :  { %v905_v16 = vmax.f32 %v837_v14, 0.0  ;;  %v3781_v17 = vpop.f32.mrb[32].mxu1 }
 0x202   :  { %v852_v18 = vadd.f32 %v3781_v17, %v4514_v47  ;;  %v846_v19 = vpop.f32.mrb[33].mxu1 }
 0x203   :  { %v847_v20 = vadd.f32 %v4514_v47, %v846_v19  ;;  %3837 = vmatprep.mubr.msk.f32.mxu1 %vm922_vm2, %v905_v16 }
 0x204   :  { %v908_v21 = vmax.f32 %v852_v18, 0.0  ;;  %3838 = vmatmul.mubr.msk.f32.gmra.mrb[68].mxu1 %vm922_vm2, %v906_v15 }
 0x205   :  { %v907_v22 = vmax.f32 %v847_v20, 0.0  ;;  %v3784_v23 = vpop.f32.mrb[34].mxu1 }
 0x206   :  { %v862_v24 = vadd.f32 %v3784_v23, %v4514_v47  ;;  %v856_v25 = vpop.f32.mrb[35].mxu1 }
 0x207   :  { %v857_v26 = vadd.f32 %v4514_v47, %v856_v25  ;;  %3840 = vmatprep.mubr.msk.f32.mxu1 %vm922_vm2, %v907_v22 }
 0x208   :  { %v910_v27 = vmax.f32 %v862_v24, 0.0  ;;  %3841 = vmatmul.mubr.msk.f32.gmra.mrb[70].mxu1 %vm922_vm2, %v908_v21 }
 0x209   :  { %v909_v28 = vmax.f32 %v857_v26, 0.0  ;;  %v3787_v29 = vpop.f32.mrb[36].mxu1 }
 0x20a   :  { %v872_v30 = vadd.f32 %v3787_v29, %v4514_v47  ;;  %v866_v31 = vpop.f32.mrb[37].mxu1 }
 0x20b   :  { %v867_v32 = vadd.f32 %v4514_v47, %v866_v31  ;;  %3843 = vmatprep.mubr.msk.f32.mxu1 %vm922_vm2, %v909_v28  ;;  %v4598_v47 = vld [vmem:[%s5375_s8 + $0x2] ss:$0 sm:$0xff] }
 0x20c   :  { %v912_v33 = vmax.f32 %v872_v30, 0.0  ;;  %3844 = vmatmul.mubr.msk.f32.gmra.mrb[72].mxu1 %vm922_vm2, %v910_v27 }
 0x20d   :  { %v911_v34 = vmax.f32 %v867_v32, 0.0 }
 0x20f   :  { %3846 = vmatprep.mubr.msk.f32.mxu1 %vm922_vm2, %v911_v34 }
 0x210   :  { %3847 = vmatmul.mubr.msk.f32.gmra.mrb[74].mxu1 %vm922_vm2, %v912_v33 }
 0x29b   :  { %v3794_v36 = vpop.f32.mrb[38].mxu1 }
 0x29c   :  { %v4601_v37 = vadd.f32 %v3794_v36, %v4598_v47  ;;  %v1103_v38 = vpop.f32.mrb[39].mxu1 }
 0x29d   :  { %v4604_v39 = vadd.f32 %v4598_v47, %v1103_v38 }
 0x29e   :  { %v1331_v40 = vmul.f32 0.5, %v4601_v37 }
 0x29f   :  { %v1330_v41 = vmul.f32 0.5, %v4604_v39  ;;  %v3797_v42 = vpop.f32.mrb[40].mxu1 }
 0x2a0   :  { %v4609_v43 = vadd.f32 %v3797_v42, %v4598_v47  ;;  %v1113_v44 = vpop.f32.mrb[41].mxu1  ;;  %v1370_v48 = vmul.f32 1.442695, %v1331_v40 }
 0x2a1   :  { %v1368_v45 = vmul.f32 1.442695, %v1330_v41  ;;  %v4612_v46 = vadd.f32 %v4598_v47, %v1113_v44 }
 0x2a2   :  { %v1333_v49 = vmul.f32 0.5, %v4609_v43 }
 0x2a3   :  { %4081 = vpow2.f32 %v1368_v45  ;;  %v1332_v50 = vmul.f32 0.5, %v4612_v46  ;;  %v3800_v59 = vpop.f32.mrb[42].mxu1 }
 0x2a4   :  { %v4617_v51 = vadd.f32 %v3800_v59, %v4598_v47  ;;  %v1123_v52 = vpop.f32.mrb[43].mxu1  ;;  %4083 = vpow2.f32 %v1370_v48  ;;  %v1374_v55 = vmul.f32 1.442695, %v1333_v49 }
 0x2a5   :  { %v1372_v53 = vmul.f32 1.442695, %v1332_v50  ;;  %v4620_v54 = vadd.f32 %v4598_v47, %v1123_v52 }
 0x2a6   :  { %v1335_v56 = vmul.f32 0.5, %v4617_v51 }
 0x2a7   :  { %4085 = vpow2.f32 %v1372_v53  ;;  %v1334_v57 = vmul.f32 0.5, %v4620_v54  ;;  %v3803_v58 = vpop.f32.mrb[44].mxu1 }
 0x2a8   :  { %v4625_v60 = vadd.f32 %v3803_v58, %v4598_v47  ;;  %v1133_v61 = vpop.f32.mrb[45].mxu1  ;;  %4087 = vpow2.f32 %v1374_v55  ;;  %v1378_v0 = vmul.f32 1.442695, %v1335_v56 }
 0x2a9   :  { %v1376_v62 = vmul.f32 1.442695, %v1334_v57  ;;  %v4628_v63 = vadd.f32 %v4598_v47, %v1133_v61 }
 0x2aa   :  { %v1337_v1 = vmul.f32 0.5, %v4625_v60 }
 0x2ab   :  { %4089 = vpow2.f32 %v1376_v62  ;;  %v1336_v2 = vmul.f32 0.5, %v4628_v63  ;;  %v3806_v3 = vpop.f32.mrb[46].mxu1 }
 0x2ac   :  { %v4633_v4 = vadd.f32 %v3806_v3, %v4598_v47  ;;  %v1143_v5 = vpop.f32.mrb[47].mxu1  ;;  %4091 = vpow2.f32 %v1378_v0  ;;  %v1382_v9 = vmul.f32 1.442695, %v1337_v1 }
 0x2ad   :  { %v4082_v6 = vpop.eup %4081  ;;  %v1380_v7 = vmul.f32 1.442695, %v1336_v2  ;;  %v4636_v8 = vadd.f32 %v4598_v47, %v1143_v5 }
 0x2ae   :  { %v1339_v10 = vmul.f32 0.5, %v4633_v4  ;;  %1482 = vrot.lane.b32.xlu0 %v4082_v6, %s4181_s5  ;;  %v4084_v13 = vpop.eup %4083 }
 0x2af   :  { %4093 = vpow2.f32 %v1380_v7  ;;  %v1338_v11 = vmul.f32 0.5, %v4636_v8  ;;  %v3809_v12 = vpop.f32.mrb[48].mxu1 }
 0x2b0   :  { %v4642_v14 = vadd.f32 %v3809_v12, %v4598_v47  ;;  %v1153_v15 = vpop.f32.mrb[49].mxu1  ;;  %4095 = vpow2.f32 %v1382_v9  ;;  %v1386_v19 = vmul.f32 1.442695, %v1339_v10 }
 0x2b1   :  { %v4086_v16 = vpop.eup %4085  ;;  %v1384_v17 = vmul.f32 1.442695, %v1338_v11  ;;  %v4645_v18 = vadd.f32 %v4598_v47, %v1153_v15 }
 0x2b2   :  { %v1341_v20 = vmul.f32 0.5, %v4642_v14  ;;  %1486 = vrot.lane.b32.xlu1 %v4086_v16, %s4181_s5  ;;  %1484 = vrot.lane.b32.xlu0 %v4084_v13, %s4181_s5  ;;  %v4088_v23 = vpop.eup %4087 }
 0x2b3   :  { %4097 = vpow2.f32 %v1384_v17  ;;  %v1340_v21 = vmul.f32 0.5, %v4645_v18  ;;  %v3812_v22 = vpop.f32.mrb[50].mxu1 }
 0x2b4   :  { %v4652_v24 = vadd.f32 %v3812_v22, %v4598_v47  ;;  %v1163_v25 = vpop.f32.mrb[51].mxu1  ;;  %4099 = vpow2.f32 %v1386_v19  ;;  %v1390_v29 = vmul.f32 1.442695, %v1341_v20 }
 0x2b5   :  { %v4090_v26 = vpop.eup %4089  ;;  %v1388_v27 = vmul.f32 1.442695, %v1340_v21  ;;  %v4655_v28 = vadd.f32 %v4598_v47, %v1163_v25 }
 0x2b6   :  { %v1343_v30 = vmul.f32 0.5, %v4652_v24  ;;  %1488 = vrot.lane.b32.xlu1 %v4088_v23, %s4181_s5  ;;  %1490 = vrot.lane.b32.xlu0 %v4090_v26, %s4181_s5  ;;  %v4092_v33 = vpop.eup %4091 }
 0x2b7   :  { %4101 = vpow2.f32 %v1388_v27  ;;  %v1342_v31 = vmul.f32 0.5, %v4655_v28  ;;  %v3815_v32 = vpop.f32.mrb[52].mxu1 }
 0x2b8   :  { %v4662_v34 = vadd.f32 %v3815_v32, %v4598_v47  ;;  %v1173_v35 = vpop.f32.mrb[53].mxu1  ;;  %4103 = vpow2.f32 %v1390_v29  ;;  %v1394_v41 = vmul.f32 1.442695, %v1343_v30 }
 0x2b9   :  { %v4094_v36 = vpop.eup %4093  ;;  %v1392_v38 = vmul.f32 1.442695, %v1342_v31  ;;  %v4665_v40 = vadd.f32 %v4598_v47, %v1173_v35 }
 0x2ba   :  { %v1345_v42 = vmul.f32 0.5, %v4662_v34  ;;  %1492 = vrot.lane.b32.xlu1 %v4092_v33, %s4181_s5  ;;  %1494 = vrot.lane.b32.xlu0 %v4094_v36, %s4181_s5  ;;  %v4096_v48 = vpop.eup %4095 }
 0x2bb   :  { %4105 = vpow2.f32 %v1392_v38  ;;  %v1344_v44 = vmul.f32 0.5, %v4665_v40  ;;  %v3818_v45 = vpop.f32.mrb[54].mxu1 }
 0x2bc   :  { %v4672_v49 = vadd.f32 %v3818_v45, %v4598_v47  ;;  %v1183_v50 = vpop.f32.mrb[55].mxu1  ;;  %4107 = vpow2.f32 %v1394_v41  ;;  %v1398_v55 = vmul.f32 1.442695, %v1345_v42 }
 0x2bd   :  { %v4098_v59 = vpop.eup %4097  ;;  %v1396_v52 = vmul.f32 1.442695, %v1344_v44  ;;  %v4675_v53 = vadd.f32 %v4598_v47, %v1183_v50 }
 0x2be   :  { %v1347_v56 = vmul.f32 0.5, %v4672_v49  ;;  %1496 = vrot.lane.b32.xlu1 %v4096_v48, %s4181_s5  ;;  %1498 = vrot.lane.b32.xlu0 %v4098_v59, %s4181_s5  ;;  %v4100_v61 = vpop.eup %4099 }
 0x2bf   :  { %4109 = vpow2.f32 %v1396_v52  ;;  %v1346_v57 = vmul.f32 0.5, %v4675_v53  ;;  %v3821_v58 = vpop.f32.mrb[56].mxu1 }
 0x2c0   :  { %v4682_v62 = vadd.f32 %v3821_v58, %v4598_v47  ;;  %v1193_v0 = vpop.f32.mrb[57].mxu1  ;;  %4111 = vpow2.f32 %v1398_v55  ;;  %v1402_v5 = vmul.f32 1.442695, %v1347_v56 }
 0x2c1   :  { %v4102_v1 = vpop.eup %4101  ;;  %v1400_v2 = vmul.f32 1.442695, %v1346_v57  ;;  %v4685_v3 = vadd.f32 %v4598_v47, %v1193_v0 }
 0x2c2   :  { %v1349_v6 = vmul.f32 0.5, %v4682_v62  ;;  %1500 = vrot.lane.b32.xlu1 %v4100_v61, %s4181_s5  ;;  %1502 = vrot.lane.b32.xlu0 %v4102_v1, %s4181_s5  ;;  %v4104_v10 = vpop.eup %4103 }
 0x2c3   :  { %4113 = vpow2.f32 %v1400_v2  ;;  %v1348_v7 = vmul.f32 0.5, %v4685_v3  ;;  %v3824_v9 = vpop.f32.mrb[58].mxu1 }
 0x2c4   :  { %v4692_v11 = vadd.f32 %v3824_v9, %v4598_v47  ;;  %v1203_v12 = vpop.f32.mrb[59].mxu1  ;;  %4115 = vpow2.f32 %v1402_v5  ;;  %v1406_v17 = vmul.f32 1.442695, %v1349_v6 }
 0x2c5   :  { %v4106_v13 = vpop.eup %4105  ;;  %v1404_v15 = vmul.f32 1.442695, %v1348_v7  ;;  %v4695_v16 = vadd.f32 %v4598_v47, %v1203_v12 }
 0x2c6   :  { %v1351_v19 = vmul.f32 0.5, %v4692_v11  ;;  %1504 = vrot.lane.b32.xlu1 %v4104_v10, %s4181_s5  ;;  %1506 = vrot.lane.b32.xlu0 %v4106_v13, %s4181_s5  ;;  %v4108_v22 = vpop.eup %4107 }
 0x2c7   :  { %4117 = vpow2.f32 %v1404_v15  ;;  %v1350_v20 = vmul.f32 0.5, %v4695_v16  ;;  %v3827_v21 = vpop.f32.mrb[60].mxu1 }
 0x2c8   :  { %v4702_v23 = vadd.f32 %v3827_v21, %v4598_v47  ;;  %v1213_v25 = vpop.f32.mrb[61].mxu1  ;;  %4119 = vpow2.f32 %v1406_v17  ;;  %v1410_v30 = vmul.f32 1.442695, %v1351_v19 }
 0x2c9   :  { %v4110_v26 = vpop.eup %4109  ;;  %v1408_v27 = vmul.f32 1.442695, %v1350_v20  ;;  %v4705_v29 = vadd.f32 %v4598_v47, %v1213_v25 }
 0x2ca   :  { %v1353_v31 = vmul.f32 0.5, %v4702_v23  ;;  %1508 = vrot.lane.b32.xlu1 %v4108_v22, %s4181_s5  ;;  %1510 = vrot.lane.b32.xlu0 %v4110_v26, %s4181_s5  ;;  %v4112_v35 = vpop.eup %4111 }
 0x2cb   :  { %4121 = vpow2.f32 %v1408_v27  ;;  %v1352_v32 = vmul.f32 0.5, %v4705_v29  ;;  %v3830_v33 = vpop.f32.mrb[62].mxu1 }
 0x2cc   :  { %v4712_v36 = vadd.f32 %v3830_v33, %v4598_v47  ;;  %v1223_v38 = vpop.f32.mrb[63].mxu1  ;;  %4123 = vpow2.f32 %v1410_v30  ;;  %v1414_v45 = vmul.f32 1.442695, %v1353_v31 }
 0x2cd   :  { %v4114_v41 = vpop.eup %4113  ;;  %v1412_v42 = vmul.f32 1.442695, %v1352_v32  ;;  %v4715_v44 = vadd.f32 %v4598_v47, %v1223_v38 }
 0x2ce   :  { %v1355_v48 = vmul.f32 0.5, %v4712_v36  ;;  %1512 = vrot.lane.b32.xlu1 %v4112_v35, %s4181_s5  ;;  %1514 = vrot.lane.b32.xlu0 %v4114_v41, %s4181_s5  ;;  %v4116_v52 = vpop.eup %4115 }
 0x2cf   :  { %4125 = vpow2.f32 %v1412_v42  ;;  %v1354_v50 = vmul.f32 0.5, %v4715_v44  ;;  %v3833_v59 = vpop.f32.mrb[64].mxu1 }
 0x2d0   :  { %v4722_v55 = vadd.f32 %v3833_v59, %v4598_v47  ;;  %v1233_v56 = vpop.f32.mrb[65].mxu1  ;;  %4127 = vpow2.f32 %v1414_v45  ;;  %v1418_v0 = vmul.f32 1.442695, %v1355_v48 }
 0x2d1   :  { %v4118_v57 = vpop.eup %4117  ;;  %v1416_v58 = vmul.f32 1.442695, %v1354_v50  ;;  %v4725_v61 = vadd.f32 %v4598_v47, %v1233_v56 }
 0x2d2   :  { %v1357_v1 = vmul.f32 0.5, %v4722_v55  ;;  %1516 = vrot.lane.b32.xlu1 %v4116_v52, %s4181_s5  ;;  %1518 = vrot.lane.b32.xlu0 %v4118_v57, %s4181_s5  ;;  %v4120_v6 = vpop.eup %4119 }
 0x2d3   :  { %4129 = vpow2.f32 %v1416_v58  ;;  %v1356_v2 = vmul.f32 0.5, %v4725_v61  ;;  %v3836_v5 = vpop.f32.mrb[66].mxu1 }
 0x2d4   :  { %v4732_v7 = vadd.f32 %v3836_v5, %v4598_v47  ;;  %v1243_v9 = vpop.f32.mrb[67].mxu1  ;;  %4131 = vpow2.f32 %v1418_v0  ;;  %v1422_v15 = vmul.f32 1.442695, %v1357_v1 }
 0x2d5   :  { %v4122_v10 = vpop.eup %4121  ;;  %v1420_v12 = vmul.f32 1.442695, %v1356_v2  ;;  %v4735_v13 = vadd.f32 %v4598_v47, %v1243_v9 }
 0x2d6   :  { %v1359_v17 = vmul.f32 0.5, %v4732_v7  ;;  %1520 = vrot.lane.b32.xlu1 %v4120_v6, %s4181_s5  ;;  %1522 = vrot.lane.b32.xlu0 %v4122_v10, %s4181_s5  ;;  %v4124_v21 = vpop.eup %4123 }
 0x2d7   :  { %4133 = vpow2.f32 %v1420_v12  ;;  %v1358_v19 = vmul.f32 0.5, %v4735_v13  ;;  %v3839_v20 = vpop.f32.mrb[68].mxu1 }
 0x2d8   :  { %v4742_v22 = vadd.f32 %v3839_v20, %v4598_v47  ;;  %v1253_v25 = vpop.f32.mrb[69].mxu1  ;;  %4135 = vpow2.f32 %v1422_v15  ;;  %v1426_v31 = vmul.f32 1.442695, %v1359_v17 }
 0x2d9   :  { %v4126_v26 = vpop.eup %4125  ;;  %v1424_v27 = vmul.f32 1.442695, %v1358_v19  ;;  %v4745_v30 = vadd.f32 %v4598_v47, %v1253_v25 }
 0x2da   :  { %v1361_v32 = vmul.f32 0.5, %v4742_v22  ;;  %1524 = vrot.lane.b32.xlu1 %v4124_v21, %s4181_s5  ;;  %1526 = vrot.lane.b32.xlu0 %v4126_v26, %s4181_s5  ;;  %v4128_v38 = vpop.eup %4127 }
 0x2db   :  { %4137 = vpow2.f32 %v1424_v27  ;;  %v1360_v33 = vmul.f32 0.5, %v4745_v30  ;;  %v3842_v35 = vpop.f32.mrb[70].mxu1 }
 0x2dc   :  { %v4752_v41 = vadd.f32 %v3842_v35, %v4598_v47  ;;  %v1263_v42 = vpop.f32.mrb[71].mxu1  ;;  %4139 = vpow2.f32 %v1426_v31  ;;  %v1430_v59 = vmul.f32 1.442695, %v1361_v32 }
 0x2dd   :  { %v4130_v45 = vpop.eup %4129  ;;  %v1428_v48 = vmul.f32 1.442695, %v1360_v33  ;;  %v4755_v50 = vadd.f32 %v4598_v47, %v1263_v42 }
 0x2de   :  { %v1363_v52 = vmul.f32 0.5, %v4752_v41  ;;  %1528 = vrot.lane.b32.xlu1 %v4128_v38, %s4181_s5  ;;  %1530 = vrot.lane.b32.xlu0 %v4130_v45, %s4181_s5  ;;  %v4132_v58 = vpop.eup %4131 }
 0x2df   :  { %4141 = vpow2.f32 %v1428_v48  ;;  %v1362_v56 = vmul.f32 0.5, %v4755_v50  ;;  %v3845_v57 = vpop.f32.mrb[72].mxu1 }
 0x2e0   :  { %v4762_v0 = vadd.f32 %v3845_v57, %v4598_v47  ;;  %v1273_v1 = vpop.f32.mrb[73].mxu1  ;;  %4143 = vpow2.f32 %v1430_v59  ;;  %v1434_v9 = vmul.f32 1.442695, %v1363_v52 }
 0x2e1   :  { %v4134_v2 = vpop.eup %4133  ;;  %v1432_v5 = vmul.f32 1.442695, %v1362_v56  ;;  %v4765_v6 = vadd.f32 %v4598_v47, %v1273_v1 }
 0x2e2   :  { %v1365_v10 = vmul.f32 0.5, %v4762_v0  ;;  %1532 = vrot.lane.b32.xlu1 %v4132_v58, %s4181_s5  ;;  %1534 = vrot.lane.b32.xlu0 %v4134_v2, %s4181_s5  ;;  %v4136_v17 = vpop.eup %4135  ;;  %v1292_v58 = vld [vmem:[%s5368_s1] sm:$0xff] }
 0x2e3   :  { %4145 = vpow2.f32 %v1432_v5  ;;  %v1364_v12 = vmul.f32 0.5, %v4765_v6  ;;  %v3848_v15 = vpop.f32.mrb[74].mxu1  ;;  %v1294_v5 = vld [vmem:[%s5368_s1 + $0x10] sm:$0xff] }
 0x2e4   :  { %v4772_v19 = vadd.f32 %v3848_v15, %v4598_v47  ;;  %v1283_v20 = vpop.f32.mrb[75].mxu1  ;;  %4147 = vpow2.f32 %v1434_v9  ;;  %v1438_v27 = vmul.f32 1.442695, %v1365_v10  ;;  %v1293_v9 = vld [vmem:[%s5368_s1 + $0x8] sm:$0xff] }
 0x2e5   :  { %v4138_v21 = vpop.eup %4137  ;;  %v1436_v25 = vmul.f32 1.442695, %v1364_v12  ;;  %v4775_v26 = vadd.f32 %v4598_v47, %v1283_v20 }
 0x2e6   :  { %1536 = vrot.lane.b32.xlu1 %v4136_v17, %s4181_s5  ;;  %1538 = vrot.lane.b32.xlu0 %v4138_v21, %s4181_s5  ;;  %v1367_v31 = vmul.f32 0.5, %v4772_v19  ;;  %v4140_v33 = vpop.eup %4139  ;;  %v1295_v21 = vld [vmem:[%s5368_s1 + $0x18] sm:$0xff] }
 0x2e7   :  { %4149 = vpow2.f32 %v1436_v25  ;;  %v1366_v32 = vmul.f32 0.5, %v4775_v26  ;;  %v1296_v25 = vld [vmem:[%s5368_s1 + $0x20] sm:$0xff] }
 0x2e8   :  { %4151 = vpow2.f32 %v1438_v27  ;;  %v1442_v47 = vmul.f32 1.442695, %v1367_v31 }
 0x2e9   :  { %v4142_v35 = vpop.eup %4141  ;;  %v1440_v38 = vmul.f32 1.442695, %v1366_v32 }
 0x2ea   :  { %1540 = vrot.lane.b32.xlu1 %v4140_v33, %s4181_s5  ;;  %1542 = vrot.lane.b32.xlu0 %v4142_v35, %s4181_s5  ;;  %v4144_v42 = vpop.eup %4143 }
 0x2eb   :  { %4153 = vpow2.f32 %v1440_v38 }
 0x2ec   :  { %4155 = vpow2.f32 %v1442_v47  ;;  %v1297_v47 = vld [vmem:[%s5368_s1 + $0x28] sm:$0xff] }
 0x2ed   :  { %v4146_v45 = vpop.eup %4145 }
 0x2ee   :  { %1544 = vrot.lane.b32.xlu1 %v4144_v42, %s4181_s5  ;;  %1546 = vrot.lane.b32.xlu0 %v4146_v45, %s4181_s5  ;;  %v4148_v48 = vpop.eup %4147  ;;  %v1298_v42 = vld [vmem:[%s5368_s1 + $0x30] sm:$0xff] }
 0x2f1   :  { %v4150_v59 = vpop.eup %4149 }
 0x2f2   :  { %1548 = vrot.lane.b32.xlu1 %v4148_v48, %s4181_s5  ;;  %1550 = vrot.lane.b32.xlu0 %v4150_v59, %s4181_s5  ;;  %v4152_v52 = vpop.eup %4151 }
 0x2f5   :  { %v4154_v56 = vpop.eup %4153 }
 0x2f6   :  { %1552 = vrot.lane.b32.xlu1 %v4152_v52, %s4181_s5  ;;  %1554 = vrot.lane.b32.xlu0 %v4154_v56, %s4181_s5  ;;  %v4156_v57 = vpop.eup %4155 }
 0x2fa   :  { %1556 = vrot.lane.b32.xlu1 %v4156_v57, %s4181_s5 }
 0x320   :  { %v1483_v1 = vpop.permute.xlu0 %1482 }
 0x321   :  { %v1596_v2 = vmul.f32 %v1483_v1, %v1292_v58  ;;  %v1299_v58 = vld [vmem:[%s5368_s1 + $0x38] sm:$0xff]  ;;  %v1300_v1 = vld [vmem:[%s5368_s1 + $0x40] sm:$0xff] }
 0x323   :  { %v1634_v10 = vadd.f32 %v1596_v2, %v4604_v39 }
 0x324   :  { %v1487_v12 = vpop.permute.xlu1 %1486  ;;  %v1485_v15 = vpop.permute.xlu0 %1484 }
 0x325   :  { %v1598_v17 = vmul.f32 %v1487_v12, %v1294_v5  ;;  %v1597_v20 = vmul.f32 %v1485_v15, %v1293_v9  ;;  %3851 = vmatprep.mubr.msk.f32.mxu0 %vm1680_vm3, %v1634_v10 }
 0x327   :  { %v1636_v27 = vadd.f32 %v1598_v17, %v4612_v46  ;;  %v1635_v31 = vadd.f32 %v1597_v20, %v4601_v37  ;;  %v1301_v17 = vld [vmem:[%s5368_s1 + $0x48] sm:$0xff]  ;;  %v1302_v20 = vld [vmem:[%s5368_s1 + $0x50] sm:$0xff] }
 0x328   :  { %v1489_v32 = vpop.permute.xlu1 %1488  ;;  %v1491_v33 = vpop.permute.xlu0 %1490 }
 0x329   :  { %v1599_v35 = vmul.f32 %v1489_v32, %v1295_v21  ;;  %v1600_v38 = vmul.f32 %v1491_v33, %v1296_v25  ;;  %3852 = vmatmul.mubr.msk.f32.vlgmr.msra.gmra.mrb[38].mxu0 %vm1680_vm3, %v1635_v31 }
 0x32a   :  { %3854 = vmatprep.mubr.msk.f32.mxu0 %vm1680_vm3, %v1636_v27 }
 0x32b   :  { %v1637_v45 = vadd.f32 %v1599_v35, %v4609_v43  ;;  %v1638_v48 = vadd.f32 %v1600_v38, %v4620_v54  ;;  %v1303_v35 = vld [vmem:[%s5368_s1 + $0x58] sm:$0xff]  ;;  %v1304_v38 = vld [vmem:[%s5368_s1 + $0x60] sm:$0xff] }
 0x32c   :  { %v1493_v59 = vpop.permute.xlu1 %1492  ;;  %v1495_v52 = vpop.permute.xlu0 %1494 }
 0x32d   :  { %v1601_v56 = vmul.f32 %v1493_v59, %v1297_v47  ;;  %v1602_v57 = vmul.f32 %v1495_v52, %v1298_v42  ;;  %3855 = vmatmul.mubr.msk.f32.gmra.mrb[40].mxu0 %vm1680_vm3, %v1637_v45 }
 0x32e   :  { %3857 = vmatprep.mubr.msk.f32.mxu0 %vm1680_vm3, %v1638_v48 }
 0x32f   :  { %v1639_v2 = vadd.f32 %v1601_v56, %v4617_v51  ;;  %v1640_v5 = vadd.f32 %v1602_v57, %v4628_v63  ;;  %v1305_v56 = vld [vmem:[%s5368_s1 + $0x68] sm:$0xff]  ;;  %v1306_v57 = vld [vmem:[%s5368_s1 + $0x70] sm:$0xff] }
 0x330   :  { %v1497_v9 = vpop.permute.xlu1 %1496  ;;  %v1499_v10 = vpop.permute.xlu0 %1498 }
 0x331   :  { %v1603_v12 = vmul.f32 %v1497_v9, %v1299_v58  ;;  %v1604_v15 = vmul.f32 %v1499_v10, %v1300_v1  ;;  %3858 = vmatmul.mubr.msk.f32.gmra.mrb[42].mxu0 %vm1680_vm3, %v1639_v2 }
 0x332   :  { %3860 = vmatprep.mubr.msk.f32.mxu0 %vm1680_vm3, %v1640_v5 }
 0x333   :  { %v1641_v21 = vadd.f32 %v1603_v12, %v4625_v60  ;;  %v1642_v25 = vadd.f32 %v1604_v15, %v4636_v8  ;;  %v1307_v12 = vld [vmem:[%s5368_s1 + $0x78] sm:$0xff]  ;;  %v1308_v15 = vld [vmem:[%s5368_s1 + $0x80] sm:$0xff] }
 0x334   :  { %v1501_v27 = vpop.permute.xlu1 %1500  ;;  %v1503_v31 = vpop.permute.xlu0 %1502 }
 0x335   :  { %v1605_v32 = vmul.f32 %v1501_v27, %v1301_v17  ;;  %v1606_v33 = vmul.f32 %v1503_v31, %v1302_v20  ;;  %3861 = vmatmul.mubr.msk.f32.gmra.mrb[44].mxu0 %vm1680_vm3, %v1641_v21 }
 0x336   :  { %3863 = vmatprep.mubr.msk.f32.mxu0 %vm1680_vm3, %v1642_v25 }
 0x337   :  { %v1643_v47 = vadd.f32 %v1605_v32, %v4633_v4  ;;  %v1644_v42 = vadd.f32 %v1606_v33, %v4645_v18  ;;  %v1309_v32 = vld [vmem:[%s5368_s1 + $0x88] sm:$0xff]  ;;  %v1310_v33 = vld [vmem:[%s5368_s1 + $0x90] sm:$0xff] }
 0x338   :  { %v1505_v45 = vpop.permute.xlu1 %1504  ;;  %v1507_v48 = vpop.permute.xlu0 %1506 }
 0x339   :  { %v1607_v59 = vmul.f32 %v1505_v45, %v1303_v35  ;;  %v1608_v52 = vmul.f32 %v1507_v48, %v1304_v38  ;;  %3864 = vmatmul.mubr.msk.f32.gmra.mrb[46].mxu0 %vm1680_vm3, %v1643_v47 }
 0x33a   :  { %3866 = vmatprep.mubr.msk.f32.mxu0 %vm1680_vm3, %v1644_v42 }
 0x33b   :  { %v1645_v58 = vadd.f32 %v1607_v59, %v4642_v14  ;;  %v1646_v1 = vadd.f32 %v1608_v52, %v4655_v28  ;;  %v1311_v59 = vld [vmem:[%s5368_s1 + $0x98] sm:$0xff]  ;;  %v1312_v52 = vld [vmem:[%s5368_s1 + $0xa0] sm:$0xff] }
 0x33c   :  { %v1509_v2 = vpop.permute.xlu1 %1508  ;;  %v1511_v5 = vpop.permute.xlu0 %1510 }
 0x33d   :  { %v1609_v9 = vmul.f32 %v1509_v2, %v1305_v56  ;;  %v1610_v10 = vmul.f32 %v1511_v5, %v1306_v57  ;;  %3867 = vmatmul.mubr.msk.f32.gmra.mrb[48].mxu0 %vm1680_vm3, %v1645_v58 }
 0x33e   :  { %3869 = vmatprep.mubr.msk.f32.mxu0 %vm1680_vm3, %v1646_v1 }
 0x33f   :  { %v1647_v17 = vadd.f32 %v1609_v9, %v4652_v24  ;;  %v1648_v20 = vadd.f32 %v1610_v10, %v4665_v40  ;;  %v1313_v9 = vld [vmem:[%s5368_s1 + $0xa8] sm:$0xff]  ;;  %v1314_v10 = vld [vmem:[%s5368_s1 + $0xb0] sm:$0xff] }
 0x340   :  { %v1513_v21 = vpop.permute.xlu1 %1512  ;;  %v1515_v25 = vpop.permute.xlu0 %1514 }
 0x341   :  { %v1611_v27 = vmul.f32 %v1513_v21, %v1307_v12  ;;  %v1612_v31 = vmul.f32 %v1515_v25, %v1308_v15  ;;  %3870 = vmatmul.mubr.msk.f32.gmra.mrb[50].mxu0 %vm1680_vm3, %v1647_v17 }
 0x342   :  { %3872 = vmatprep.mubr.msk.f32.mxu0 %vm1680_vm3, %v1648_v20 }
 0x343   :  { %v1649_v35 = vadd.f32 %v1611_v27, %v4662_v34  ;;  %v1650_v38 = vadd.f32 %v1612_v31, %v4675_v53  ;;  %v1315_v27 = vld [vmem:[%s5368_s1 + $0xb8] sm:$0xff]  ;;  %v1316_v31 = vld [vmem:[%s5368_s1 + $0xc0] sm:$0xff] }
 0x344   :  { %v1517_v47 = vpop.permute.xlu1 %1516  ;;  %v1519_v42 = vpop.permute.xlu0 %1518 }
 0x345   :  { %v1613_v45 = vmul.f32 %v1517_v47, %v1309_v32  ;;  %v1614_v48 = vmul.f32 %v1519_v42, %v1310_v33  ;;  %3873 = vmatmul.mubr.msk.f32.gmra.mrb[52].mxu0 %vm1680_vm3, %v1649_v35 }
 0x346   :  { %3875 = vmatprep.mubr.msk.f32.mxu0 %vm1680_vm3, %v1650_v38 }
 0x347   :  { %v1651_v56 = vadd.f32 %v1613_v45, %v4672_v49  ;;  %v1652_v57 = vadd.f32 %v1614_v48, %v4685_v3  ;;  %v1317_v45 = vld [vmem:[%s5368_s1 + $0xc8] sm:$0xff]  ;;  %v1318_v48 = vld [vmem:[%s5368_s1 + $0xd0] sm:$0xff] }
 0x348   :  { %v1521_v58 = vpop.permute.xlu1 %1520  ;;  %v1523_v1 = vpop.permute.xlu0 %1522 }
 0x349   :  { %v1615_v2 = vmul.f32 %v1521_v58, %v1311_v59  ;;  %v1616_v5 = vmul.f32 %v1523_v1, %v1312_v52  ;;  %3876 = vmatmul.mubr.msk.f32.gmra.mrb[54].mxu0 %vm1680_vm3, %v1651_v56 }
 0x34a   :  { %3878 = vmatprep.mubr.msk.f32.mxu0 %vm1680_vm3, %v1652_v57 }
 0x34b   :  { %v1653_v12 = vadd.f32 %v1615_v2, %v4682_v62  ;;  %v1654_v15 = vadd.f32 %v1616_v5, %v4695_v16  ;;  %v1319_v2 = vld [vmem:[%s5368_s1 + $0xd8] sm:$0xff]  ;;  %v1320_v5 = vld [vmem:[%s5368_s1 + $0xe0] sm:$0xff] }
 0x34c   :  { %v1525_v17 = vpop.permute.xlu1 %1524  ;;  %v1527_v20 = vpop.permute.xlu0 %1526 }
 0x34d   :  { %v1617_v21 = vmul.f32 %v1525_v17, %v1313_v9  ;;  %v1618_v25 = vmul.f32 %v1527_v20, %v1314_v10  ;;  %3879 = vmatmul.mubr.msk.f32.gmra.mrb[56].mxu0 %vm1680_vm3, %v1653_v12 }
 0x34e   :  { %3881 = vmatprep.mubr.msk.f32.mxu0 %vm1680_vm3, %v1654_v15 }
 0x34f   :  { %v1655_v32 = vadd.f32 %v1617_v21, %v4692_v11  ;;  %v1656_v33 = vadd.f32 %v1618_v25, %v4705_v29  ;;  %v1321_v21 = vld [vmem:[%s5368_s1 + $0xe8] sm:$0xff]  ;;  %v1322_v25 = vld [vmem:[%s5368_s1 + $0xf0] sm:$0xff] }
 0x350   :  { %v1529_v35 = vpop.permute.xlu1 %1528  ;;  %v1531_v38 = vpop.permute.xlu0 %1530 }
 0x351   :  { %v1619_v47 = vmul.f32 %v1529_v35, %v1315_v27  ;;  %v1620_v42 = vmul.f32 %v1531_v38, %v1316_v31  ;;  %3882 = vmatmul.mubr.msk.f32.gmra.mrb[58].mxu0 %vm1680_vm3, %v1655_v32 }
 0x352   :  { %3884 = vmatprep.mubr.msk.f32.mxu0 %vm1680_vm3, %v1656_v33 }
 0x353   :  { %v1657_v59 = vadd.f32 %v1619_v47, %v4702_v23  ;;  %v1658_v52 = vadd.f32 %v1620_v42, %v4715_v44  ;;  %v1323_v47 = vld [vmem:[%s5368_s1 + $0xf8] sm:$0xff]  ;;  %v1324_v42 = vld [vmem:[%s5368_s1 + $0x100] sm:$0xff] }
 0x354   :  { %v1533_v56 = vpop.permute.xlu1 %1532  ;;  %v1535_v57 = vpop.permute.xlu0 %1534 }
 0x355   :  { %v1621_v58 = vmul.f32 %v1533_v56, %v1317_v45  ;;  %v1622_v1 = vmul.f32 %v1535_v57, %v1318_v48  ;;  %3885 = vmatmul.mubr.msk.f32.gmra.mrb[60].mxu0 %vm1680_vm3, %v1657_v59 }
 0x356   :  { %3887 = vmatprep.mubr.msk.f32.mxu0 %vm1680_vm3, %v1658_v52 }
 0x357   :  { %v1659_v9 = vadd.f32 %v1621_v58, %v4712_v36  ;;  %v1660_v10 = vadd.f32 %v1622_v1, %v4725_v61  ;;  %v1325_v58 = vld [vmem:[%s5368_s1 + $0x108] sm:$0xff]  ;;  %v1326_v1 = vld [vmem:[%s5368_s1 + $0x110] sm:$0xff] }
 0x358   :  { %v1537_v12 = vpop.permute.xlu1 %1536  ;;  %v1539_v15 = vpop.permute.xlu0 %1538 }
 0x359   :  { %v1623_v17 = vmul.f32 %v1537_v12, %v1319_v2  ;;  %v1624_v20 = vmul.f32 %v1539_v15, %v1320_v5  ;;  %3888 = vmatmul.mubr.msk.f32.gmra.mrb[62].mxu0 %vm1680_vm3, %v1659_v9 }
 0x35a   :  { %3890 = vmatprep.mubr.msk.f32.mxu0 %vm1680_vm3, %v1660_v10 }
 0x35b   :  { %v1661_v27 = vadd.f32 %v1623_v17, %v4722_v55  ;;  %v1662_v31 = vadd.f32 %v1624_v20, %v4735_v13  ;;  %v1327_v17 = vld [vmem:[%s5368_s1 + $0x118] sm:$0xff]  ;;  %v1328_v20 = vld [vmem:[%s5368_s1 + $0x120] sm:$0xff] }
 0x35c   :  { %v1541_v32 = vpop.permute.xlu1 %1540  ;;  %v1543_v33 = vpop.permute.xlu0 %1542 }
 0x35d   :  { %v1625_v35 = vmul.f32 %v1541_v32, %v1321_v21  ;;  %v1626_v38 = vmul.f32 %v1543_v33, %v1322_v25  ;;  %3891 = vmatmul.mubr.msk.f32.gmra.mrb[64].mxu0 %vm1680_vm3, %v1661_v27 }
 0x35e   :  { %3893 = vmatprep.mubr.msk.f32.mxu0 %vm1680_vm3, %v1662_v31 }
 0x35f   :  { %v1663_v45 = vadd.f32 %v1625_v35, %v4732_v7  ;;  %v1664_v48 = vadd.f32 %v1626_v38, %v4745_v30  ;;  %v1329_v35 = vld [vmem:[%s5368_s1 + $0x128] sm:$0xff] }
 0x360   :  { %v1545_v59 = vpop.permute.xlu1 %1544  ;;  %v1547_v52 = vpop.permute.xlu0 %1546 }
 0x361   :  { %v1627_v56 = vmul.f32 %v1545_v59, %v1323_v47  ;;  %v1628_v57 = vmul.f32 %v1547_v52, %v1324_v42  ;;  %3894 = vmatmul.mubr.msk.f32.gmra.mrb[66].mxu0 %vm1680_vm3, %v1663_v45  ;;  %v2088_v59 = vld [vmem:[%s5373_s6] sm:$0xff]  ;;  %v2089_v52 = vld [vmem:[%s5373_s6 + $0x8] sm:$0xff] }
 0x362   :  { %3896 = vmatprep.mubr.msk.f32.mxu0 %vm1680_vm3, %v1664_v48 }
 0x363   :  { %v1665_v2 = vadd.f32 %v1627_v56, %v4742_v22  ;;  %v1666_v5 = vadd.f32 %v1628_v57, %v4755_v50  ;;  %v4062_v56 = vpack.c.bf16 %v2089_v52, %v2088_v59  ;;  %v2504_v57 = vld [vmem:[%s5374_s7] sm:$0xff] }
 0x364   :  { %v1549_v9 = vpop.permute.xlu1 %1548  ;;  %v1551_v10 = vpop.permute.xlu0 %1550 }
 0x365   :  { %v1629_v12 = vmul.f32 %v1549_v9, %v1325_v58  ;;  %v1630_v15 = vmul.f32 %v1551_v10, %v1326_v1  ;;  %3897 = vmatmul.mubr.msk.f32.gmra.mrb[68].mxu0 %vm1680_vm3, %v1665_v2  ;;  %4063 = vmatprep.subr.bf16.mxu1 %v4062_v56  ;;  %v2505_v58 = vld [vmem:[%s5374_s7 + $0x8] sm:$0xff]  ;;  %v2506_v1 = vld [vmem:[%s5374_s7 + $0x10] sm:$0xff]  ;;  %v5001_v10 = vld [vmem:[%s5375_s8 + $0x3] ss:$0 sm:$0xff] }
 0x366   :  { %3899 = vmatprep.mubr.msk.f32.mxu0 %vm1680_vm3, %v1666_v5  ;;  %v4066_v2 = vpack.c.bf16 %v2505_v58, %v2504_v57  ;;  %v2507_v5 = vld [vmem:[%s5374_s7 + $0x18] sm:$0xff] }
 0x367   :  { %v1667_v21 = vadd.f32 %v1629_v12, %v4752_v41  ;;  %v1668_v25 = vadd.f32 %v1630_v15, %v4765_v6  ;;  %v4070_v9 = vpack.c.bf16 %v2507_v5, %v2506_v1 }
 0x368   :  { %v1553_v27 = vpop.permute.xlu1 %1552  ;;  %v1555_v31 = vpop.permute.xlu0 %1554  ;;  %4067 = vmatprep.subr.bf16.mxu0 %v4066_v2 }
 0x369   :  { %v1631_v32 = vmul.f32 %v1553_v27, %v1327_v17  ;;  %v1632_v33 = vmul.f32 %v1555_v31, %v1328_v20  ;;  %3900 = vmatmul.mubr.msk.f32.gmra.mrb[70].mxu0 %vm1680_vm3, %v1667_v21 }
 0x36a   :  { %3902 = vmatprep.mubr.msk.f32.mxu0 %vm1680_vm3, %v1668_v25  ;;  %4069 = vmatpush3.bf16.msra.mxu0 %v4066_v2 }
 0x36b   :  { %v1669_v38 = vadd.f32 %v1631_v32, %v4762_v0  ;;  %v1670_v47 = vadd.f32 %v1632_v33, %v4775_v26  ;;  %4071 = vmatprep.subr.bf16.mxu0 %v4070_v9 }
 0x36c   :  { %v1557_v42 = vpop.permute.xlu1 %1556 }
 0x36d   :  { %v1633_v45 = vmul.f32 %v1557_v42, %v1329_v35  ;;  %3903 = vmatmul.mubr.msk.f32.gmra.mrb[72].mxu0 %vm1680_vm3, %v1669_v38  ;;  %3905 = vmatprep.mubr.msk.f32.mxu1 %vm1680_vm3, %v1670_v47 }
 0x36e   :  { %4073 = vmatpush3.bf16.msra.mxu0 %v4070_v9 }
 0x36f   :  { %v1671_v48 = vadd.f32 %v1633_v45, %v4772_v19 }
 0x371   :  { %3906 = vmatmul.mubr.msk.f32.vlgmr.msra.gmra.mrb[76].mxu1 %vm1680_vm3, %v1671_v48 }
 0x372   :  { %4065 = vmatpush3.bf16.msra.mxu1 %v4062_v56 }
 0x3fc   :  { %v3853_v12 = vpop.f32.mrb[38].mxu0 }
 0x3fd   :  { %v1867_v15 = vadd.f32 %v3853_v12, %v5001_v10  ;;  %v1861_v17 = vpop.f32.mrb[39].mxu0 }
 0x3fe   :  { %v1862_v20 = vadd.f32 %v5001_v10, %v1861_v17 }
 0x3ff   :  { %v2051_v27 = vmax.f32 %v1867_v15, 0.0 }
 0x400   :  { %v2050_v21 = vmax.f32 %v1862_v20, 0.0  ;;  %v3856_v25 = vpop.f32.mrb[40].mxu0 }
 0x401   :  { %v1877_v31 = vadd.f32 %v3856_v25, %v5001_v10  ;;  %v1871_v32 = vpop.f32.mrb[41].mxu0 }
 0x402   :  { %v1872_v33 = vadd.f32 %v5001_v10, %v1871_v32  ;;  %3912 = vmatprep.mubr.msk.f32.mxu1 %vm922_vm2, %v2050_v21 }
 0x403   :  { %3913 = vmatmul.mubr.msk.f32.vlgmr.msra.gmra.mrb[78].mxu1 %vm922_vm2, %v2051_v27  ;;  %v2053_v47 = vmax.f32 %v1877_v31, 0.0 }
 0x404   :  { %v2052_v35 = vmax.f32 %v1872_v33, 0.0  ;;  %v3859_v38 = vpop.f32.mrb[42].mxu0 }
 0x405   :  { %v1887_v42 = vadd.f32 %v3859_v38, %v5001_v10  ;;  %v1881_v45 = vpop.f32.mrb[43].mxu0 }
 0x406   :  { %v1882_v48 = vadd.f32 %v5001_v10, %v1881_v45  ;;  %3915 = vmatprep.mubr.msk.f32.mxu1 %vm922_vm2, %v2052_v35 }
 0x407   :  { %3916 = vmatmul.mubr.msk.f32.gmra.mrb[80].mxu1 %vm922_vm2, %v2053_v47  ;;  %v2055_v56 = vmax.f32 %v1887_v42, 0.0 }
 0x408   :  { %v2054_v59 = vmax.f32 %v1882_v48, 0.0  ;;  %v3862_v52 = vpop.f32.mrb[44].mxu0 }
 0x409   :  { %v1897_v57 = vadd.f32 %v3862_v52, %v5001_v10  ;;  %v1891_v58 = vpop.f32.mrb[45].mxu0 }
 0x40a   :  { %v1892_v1 = vadd.f32 %v5001_v10, %v1891_v58  ;;  %3918 = vmatprep.mubr.msk.f32.mxu1 %vm922_vm2, %v2054_v59 }
 0x40b   :  { %3919 = vmatmul.mubr.msk.f32.gmra.mrb[82].mxu1 %vm922_vm2, %v2055_v56  ;;  %v2057_v9 = vmax.f32 %v1897_v57, 0.0 }
 0x40c   :  { %v2056_v2 = vmax.f32 %v1892_v1, 0.0  ;;  %v3865_v5 = vpop.f32.mrb[46].mxu0 }
 0x40d   :  { %v1907_v12 = vadd.f32 %v3865_v5, %v5001_v10  ;;  %v1901_v15 = vpop.f32.mrb[47].mxu0 }
 0x40e   :  { %v1902_v17 = vadd.f32 %v5001_v10, %v1901_v15  ;;  %3921 = vmatprep.mubr.msk.f32.mxu1 %vm922_vm2, %v2056_v2 }
 0x40f   :  { %3922 = vmatmul.mubr.msk.f32.gmra.mrb[84].mxu1 %vm922_vm2, %v2057_v9  ;;  %v2059_v25 = vmax.f32 %v1907_v12, 0.0 }
 0x410   :  { %v2058_v20 = vmax.f32 %v1902_v17, 0.0  ;;  %v3868_v21 = vpop.f32.mrb[48].mxu0 }
 0x411   :  { %v1917_v27 = vadd.f32 %v3868_v21, %v5001_v10  ;;  %v1911_v31 = vpop.f32.mrb[49].mxu0 }
 0x412   :  { %v1912_v32 = vadd.f32 %v5001_v10, %v1911_v31  ;;  %3924 = vmatprep.mubr.msk.f32.mxu1 %vm922_vm2, %v2058_v20 }
 0x413   :  { %3925 = vmatmul.mubr.msk.f32.gmra.mrb[86].mxu1 %vm922_vm2, %v2059_v25  ;;  %v2061_v38 = vmax.f32 %v1917_v27, 0.0 }
 0x414   :  { %v2060_v33 = vmax.f32 %v1912_v32, 0.0  ;;  %v3871_v35 = vpop.f32.mrb[50].mxu0 }
 0x415   :  { %v1927_v47 = vadd.f32 %v3871_v35, %v5001_v10  ;;  %v1921_v42 = vpop.f32.mrb[51].mxu0 }
 0x416   :  { %v1922_v45 = vadd.f32 %v5001_v10, %v1921_v42  ;;  %3927 = vmatprep.mubr.msk.f32.mxu1 %vm922_vm2, %v2060_v33 }
 0x417   :  { %3928 = vmatmul.mubr.msk.f32.gmra.mrb[88].mxu1 %vm922_vm2, %v2061_v38  ;;  %v2063_v52 = vmax.f32 %v1927_v47, 0.0 }
 0x418   :  { %v2062_v48 = vmax.f32 %v1922_v45, 0.0  ;;  %v3874_v59 = vpop.f32.mrb[52].mxu0 }
 0x419   :  { %v1937_v56 = vadd.f32 %v3874_v59, %v5001_v10  ;;  %v1931_v57 = vpop.f32.mrb[53].mxu0 }
 0x41a   :  { %v1932_v58 = vadd.f32 %v5001_v10, %v1931_v57  ;;  %3930 = vmatprep.mubr.msk.f32.mxu1 %vm922_vm2, %v2062_v48 }
 0x41b   :  { %3931 = vmatmul.mubr.msk.f32.gmra.mrb[90].mxu1 %vm922_vm2, %v2063_v52  ;;  %v2065_v5 = vmax.f32 %v1937_v56, 0.0 }
 0x41c   :  { %v2064_v1 = vmax.f32 %v1932_v58, 0.0  ;;  %v3877_v2 = vpop.f32.mrb[54].mxu0 }
 0x41d   :  { %v1947_v9 = vadd.f32 %v3877_v2, %v5001_v10  ;;  %v1941_v12 = vpop.f32.mrb[55].mxu0 }
 0x41e   :  { %v1942_v15 = vadd.f32 %v5001_v10, %v1941_v12  ;;  %3933 = vmatprep.mubr.msk.f32.mxu1 %vm922_vm2, %v2064_v1 }
 0x41f   :  { %3934 = vmatmul.mubr.msk.f32.gmra.mrb[92].mxu1 %vm922_vm2, %v2065_v5  ;;  %v2067_v21 = vmax.f32 %v1947_v9, 0.0 }
 0x420   :  { %v2066_v17 = vmax.f32 %v1942_v15, 0.0  ;;  %v3880_v20 = vpop.f32.mrb[56].mxu0 }
 0x421   :  { %v1957_v25 = vadd.f32 %v3880_v20, %v5001_v10  ;;  %v1951_v27 = vpop.f32.mrb[57].mxu0 }
 0x422   :  { %v1952_v31 = vadd.f32 %v5001_v10, %v1951_v27  ;;  %3936 = vmatprep.mubr.msk.f32.mxu1 %vm922_vm2, %v2066_v17 }
 0x423   :  { %3937 = vmatmul.mubr.msk.f32.gmra.mrb[94].mxu1 %vm922_vm2, %v2067_v21  ;;  %v2069_v35 = vmax.f32 %v1957_v25, 0.0 }
 0x424   :  { %v2068_v32 = vmax.f32 %v1952_v31, 0.0  ;;  %v3883_v33 = vpop.f32.mrb[58].mxu0 }
 0x425   :  { %v1967_v38 = vadd.f32 %v3883_v33, %v5001_v10  ;;  %v1961_v47 = vpop.f32.mrb[59].mxu0 }
 0x426   :  { %v1962_v42 = vadd.f32 %v5001_v10, %v1961_v47  ;;  %3939 = vmatprep.mubr.msk.f32.mxu1 %vm922_vm2, %v2068_v32 }
 0x427   :  { %3940 = vmatmul.mubr.msk.f32.gmra.mrb[96].mxu1 %vm922_vm2, %v2069_v35  ;;  %v2071_v59 = vmax.f32 %v1967_v38, 0.0 }
 0x428   :  { %v2070_v45 = vmax.f32 %v1962_v42, 0.0  ;;  %v3886_v48 = vpop.f32.mrb[60].mxu0 }
 0x429   :  { %v1977_v52 = vadd.f32 %v3886_v48, %v5001_v10  ;;  %v1971_v56 = vpop.f32.mrb[61].mxu0 }
 0x42a   :  { %v1972_v57 = vadd.f32 %v5001_v10, %v1971_v56  ;;  %3942 = vmatprep.mubr.msk.f32.mxu1 %vm922_vm2, %v2070_v45 }
 0x42b   :  { %3943 = vmatmul.mubr.msk.f32.gmra.mrb[98].mxu1 %vm922_vm2, %v2071_v59  ;;  %v2073_v2 = vmax.f32 %v1977_v52, 0.0 }
 0x42c   :  { %v2072_v58 = vmax.f32 %v1972_v57, 0.0  ;;  %v3889_v1 = vpop.f32.mrb[62].mxu0 }
 0x42d   :  { %v1987_v5 = vadd.f32 %v3889_v1, %v5001_v10  ;;  %v1981_v9 = vpop.f32.mrb[63].mxu0 }
 0x42e   :  { %v1982_v12 = vadd.f32 %v5001_v10, %v1981_v9  ;;  %3945 = vmatprep.mubr.msk.f32.mxu1 %vm922_vm2, %v2072_v58 }
 0x42f   :  { %3946 = vmatmul.mubr.msk.f32.gmra.mrb[100].mxu1 %vm922_vm2, %v2073_v2  ;;  %v2075_v20 = vmax.f32 %v1987_v5, 0.0 }
 0x430   :  { %v2074_v15 = vmax.f32 %v1982_v12, 0.0  ;;  %v3892_v17 = vpop.f32.mrb[64].mxu0 }
 0x431   :  { %v1997_v21 = vadd.f32 %v3892_v17, %v5001_v10  ;;  %v1991_v25 = vpop.f32.mrb[65].mxu0 }
 0x432   :  { %v1992_v27 = vadd.f32 %v5001_v10, %v1991_v25  ;;  %3948 = vmatprep.mubr.msk.f32.mxu1 %vm922_vm2, %v2074_v15 }
 0x433   :  { %3949 = vmatmul.mubr.msk.f32.gmra.mrb[102].mxu1 %vm922_vm2, %v2075_v20  ;;  %v2077_v33 = vmax.f32 %v1997_v21, 0.0 }
 0x434   :  { %v2076_v31 = vmax.f32 %v1992_v27, 0.0  ;;  %v3895_v32 = vpop.f32.mrb[66].mxu0 }
 0x435   :  { %v2007_v35 = vadd.f32 %v3895_v32, %v5001_v10  ;;  %v2001_v38 = vpop.f32.mrb[67].mxu0 }
 0x436   :  { %v2002_v47 = vadd.f32 %v5001_v10, %v2001_v38  ;;  %3951 = vmatprep.mubr.msk.f32.mxu1 %vm922_vm2, %v2076_v31 }
 0x437   :  { %3952 = vmatmul.mubr.msk.f32.gmra.mrb[104].mxu1 %vm922_vm2, %v2077_v33  ;;  %v2079_v48 = vmax.f32 %v2007_v35, 0.0 }
 0x438   :  { %v2078_v42 = vmax.f32 %v2002_v47, 0.0  ;;  %v3898_v45 = vpop.f32.mrb[68].mxu0 }
 0x439   :  { %v2017_v59 = vadd.f32 %v3898_v45, %v5001_v10  ;;  %v2011_v52 = vpop.f32.mrb[69].mxu0  ;;  %v5082_v45 = vld [vmem:[%s5375_s8 + $0x4] ss:$0 sm:$0xff] }
 0x43a   :  { %v2012_v56 = vadd.f32 %v5001_v10, %v2011_v52  ;;  %3954 = vmatprep.mubr.msk.f32.mxu1 %vm922_vm2, %v2078_v42 }
 0x43b   :  { %3955 = vmatmul.mubr.msk.f32.gmra.mrb[106].mxu1 %vm922_vm2, %v2079_v48  ;;  %v2081_v1 = vmax.f32 %v2017_v59, 0.0 }
 0x43c   :  { %v2080_v57 = vmax.f32 %v2012_v56, 0.0  ;;  %v3901_v58 = vpop.f32.mrb[70].mxu0 }
 0x43d   :  { %v2027_v2 = vadd.f32 %v3901_v58, %v5001_v10  ;;  %v2021_v5 = vpop.f32.mrb[71].mxu0 }
 0x43e   :  { %v2022_v9 = vadd.f32 %v5001_v10, %v2021_v5  ;;  %3957 = vmatprep.mubr.msk.f32.mxu1 %vm922_vm2, %v2080_v57 }
 0x43f   :  { %3958 = vmatmul.mubr.msk.f32.gmra.mrb[108].mxu1 %vm922_vm2, %v2081_v1  ;;  %v2083_v17 = vmax.f32 %v2027_v2, 0.0 }
 0x440   :  { %v2082_v12 = vmax.f32 %v2022_v9, 0.0  ;;  %v3904_v15 = vpop.f32.mrb[72].mxu0 }
 0x441   :  { %v2037_v20 = vadd.f32 %v3904_v15, %v5001_v10  ;;  %v2031_v21 = vpop.f32.mrb[73].mxu0 }
 0x442   :  { %v2032_v25 = vadd.f32 %v5001_v10, %v2031_v21  ;;  %3960 = vmatprep.mubr.msk.f32.mxu1 %vm922_vm2, %v2082_v12 }
 0x443   :  { %3961 = vmatmul.mubr.msk.f32.gmra.mrb[110].mxu1 %vm922_vm2, %v2083_v17  ;;  %v2085_v32 = vmax.f32 %v2037_v20, 0.0 }
 0x444   :  { %v2084_v27 = vmax.f32 %v2032_v25, 0.0  ;;  %v3907_v31 = vpop.f32.mrb[76].mxu1 }
 0x445   :  { %v2047_v33 = vadd.f32 %v3907_v31, %v5001_v10  ;;  %v2041_v35 = vpop.f32.mrb[77].mxu1 }
 0x446   :  { %v2042_v38 = vadd.f32 %v5001_v10, %v2041_v35  ;;  %3963 = vmatprep.mubr.msk.f32.mxu1 %vm922_vm2, %v2084_v27 }
 0x447   :  { %3964 = vmatmul.mubr.msk.f32.gmra.mrb[112].mxu1 %vm922_vm2, %v2085_v32  ;;  %v2087_v42 = vmax.f32 %v2047_v33, 0.0 }
 0x448   :  { %v2086_v47 = vmax.f32 %v2042_v38, 0.0 }
 0x44a   :  { %3966 = vmatprep.mubr.msk.f32.mxu1 %vm922_vm2, %v2086_v47 }
 0x44b   :  { %3967 = vmatmul.mubr.msk.f32.gmra.mrb[114].mxu1 %vm922_vm2, %v2087_v42 }
 0x4d6   :  { %v3914_v48 = vpop.f32.mrb[78].mxu1 }
 0x4d7   :  { %v2283_v59 = vadd.f32 %v3914_v48, %v5082_v45  ;;  %v2277_v52 = vpop.f32.mrb[79].mxu1 }
 0x4d8   :  { %v2278_v10 = vadd.f32 %v5082_v45, %v2277_v52 }
 0x4d9   :  { %v2467_v58 = vmax.f32 %v2283_v59, 0.0 }
 0x4da   :  { %v2466_v56 = vmax.f32 %v2278_v10, 0.0  ;;  %v3917_v57 = vpop.f32.mrb[80].mxu1 }
 0x4db   :  { %v2293_v1 = vadd.f32 %v3917_v57, %v5082_v45  ;;  %v2287_v2 = vpop.f32.mrb[81].mxu1 }
 0x4dc   :  { %v2288_v5 = vadd.f32 %v5082_v45, %v2287_v2  ;;  %3977 = vmatprep.mubr.msk.f32.mxu0 %vm505_vm1, %v2466_v56 }
 0x4dd   :  { %3978 = vmatmul.mubr.msk.f32.vlgmr.msra.gmra.mrb[74].mxu0 %vm505_vm1, %v2467_v58  ;;  %v2469_v15 = vmax.f32 %v2293_v1, 0.0 }
 0x4de   :  { %v2468_v9 = vmax.f32 %v2288_v5, 0.0  ;;  %v3920_v12 = vpop.f32.mrb[82].mxu1 }
 0x4df   :  { %v2303_v17 = vadd.f32 %v3920_v12, %v5082_v45  ;;  %v2297_v20 = vpop.f32.mrb[83].mxu1 }
 0x4e0   :  { %v2298_v21 = vadd.f32 %v5082_v45, %v2297_v20  ;;  %3980 = vmatprep.mubr.msk.f32.mxu0 %vm505_vm1, %v2468_v9 }
 0x4e1   :  { %3981 = vmatmul.mubr.msk.f32.gmra.mrb[76].mxu0 %vm505_vm1, %v2469_v15  ;;  %v2471_v31 = vmax.f32 %v2303_v17, 0.0 }
 0x4e2   :  { %v2470_v25 = vmax.f32 %v2298_v21, 0.0  ;;  %v3923_v27 = vpop.f32.mrb[84].mxu1 }
 0x4e3   :  { %v2313_v32 = vadd.f32 %v3923_v27, %v5082_v45  ;;  %v2307_v33 = vpop.f32.mrb[85].mxu1 }
 0x4e4   :  { %v2308_v35 = vadd.f32 %v5082_v45, %v2307_v33  ;;  %3983 = vmatprep.mubr.msk.f32.mxu0 %vm505_vm1, %v2470_v25 }
 0x4e5   :  { %3984 = vmatmul.mubr.msk.f32.gmra.mrb[78].mxu0 %vm505_vm1, %v2471_v31  ;;  %v2473_v42 = vmax.f32 %v2313_v32, 0.0 }
 0x4e6   :  { %v2472_v38 = vmax.f32 %v2308_v35, 0.0  ;;  %v3926_v47 = vpop.f32.mrb[86].mxu1 }
 0x4e7   :  { %v2323_v48 = vadd.f32 %v3926_v47, %v5082_v45  ;;  %v2317_v59 = vpop.f32.mrb[87].mxu1 }
 0x4e8   :  { %v2318_v52 = vadd.f32 %v5082_v45, %v2317_v59  ;;  %3986 = vmatprep.mubr.msk.f32.mxu0 %vm505_vm1, %v2472_v38 }
 0x4e9   :  { %3987 = vmatmul.mubr.msk.f32.gmra.mrb[80].mxu0 %vm505_vm1, %v2473_v42  ;;  %v2475_v57 = vmax.f32 %v2323_v48, 0.0 }
 0x4ea   :  { %v2474_v10 = vmax.f32 %v2318_v52, 0.0  ;;  %v3929_v56 = vpop.f32.mrb[88].mxu1 }
 0x4eb   :  { %v2333_v58 = vadd.f32 %v3929_v56, %v5082_v45  ;;  %v2327_v1 = vpop.f32.mrb[89].mxu1 }
 0x4ec   :  { %v2328_v2 = vadd.f32 %v5082_v45, %v2327_v1  ;;  %3989 = vmatprep.mubr.msk.f32.mxu0 %vm505_vm1, %v2474_v10 }
 0x4ed   :  { %3990 = vmatmul.mubr.msk.f32.gmra.mrb[82].mxu0 %vm505_vm1, %v2475_v57  ;;  %v2477_v12 = vmax.f32 %v2333_v58, 0.0 }
 0x4ee   :  { %v2476_v5 = vmax.f32 %v2328_v2, 0.0  ;;  %v3932_v9 = vpop.f32.mrb[90].mxu1 }
 0x4ef   :  { %v2343_v15 = vadd.f32 %v3932_v9, %v5082_v45  ;;  %v2337_v17 = vpop.f32.mrb[91].mxu1 }
 0x4f0   :  { %v2338_v20 = vadd.f32 %v5082_v45, %v2337_v17  ;;  %3992 = vmatprep.mubr.msk.f32.mxu0 %vm505_vm1, %v2476_v5 }
 0x4f1   :  { %3993 = vmatmul.mubr.msk.f32.gmra.mrb[84].mxu0 %vm505_vm1, %v2477_v12  ;;  %v2479_v27 = vmax.f32 %v2343_v15, 0.0 }
 0x4f2   :  { %v2478_v21 = vmax.f32 %v2338_v20, 0.0  ;;  %v3935_v25 = vpop.f32.mrb[92].mxu1 }
 0x4f3   :  { %v2353_v31 = vadd.f32 %v3935_v25, %v5082_v45  ;;  %v2347_v32 = vpop.f32.mrb[93].mxu1 }
 0x4f4   :  { %v2348_v33 = vadd.f32 %v5082_v45, %v2347_v32  ;;  %3995 = vmatprep.mubr.msk.f32.mxu0 %vm505_vm1, %v2478_v21 }
 0x4f5   :  { %3996 = vmatmul.mubr.msk.f32.gmra.mrb[86].mxu0 %vm505_vm1, %v2479_v27  ;;  %v2481_v47 = vmax.f32 %v2353_v31, 0.0 }
 0x4f6   :  { %v2480_v35 = vmax.f32 %v2348_v33, 0.0  ;;  %v3938_v38 = vpop.f32.mrb[94].mxu1 }
 0x4f7   :  { %v2363_v42 = vadd.f32 %v3938_v38, %v5082_v45  ;;  %v2357_v48 = vpop.f32.mrb[95].mxu1 }
 0x4f8   :  { %v2358_v59 = vadd.f32 %v5082_v45, %v2357_v48  ;;  %3998 = vmatprep.mubr.msk.f32.mxu0 %vm505_vm1, %v2480_v35 }
 0x4f9   :  { %3999 = vmatmul.mubr.msk.f32.gmra.mrb[88].mxu0 %vm505_vm1, %v2481_v47  ;;  %v2483_v56 = vmax.f32 %v2363_v42, 0.0 }
 0x4fa   :  { %v2482_v52 = vmax.f32 %v2358_v59, 0.0  ;;  %v3941_v10 = vpop.f32.mrb[96].mxu1 }
 0x4fb   :  { %v2373_v57 = vadd.f32 %v3941_v10, %v5082_v45  ;;  %v2367_v58 = vpop.f32.mrb[97].mxu1 }
 0x4fc   :  { %v2368_v1 = vadd.f32 %v5082_v45, %v2367_v58  ;;  %4001 = vmatprep.mubr.msk.f32.mxu0 %vm505_vm1, %v2482_v52 }
 0x4fd   :  { %4002 = vmatmul.mubr.msk.f32.gmra.mrb[90].mxu0 %vm505_vm1, %v2483_v56  ;;  %v2485_v9 = vmax.f32 %v2373_v57, 0.0 }
 0x4fe   :  { %v2484_v2 = vmax.f32 %v2368_v1, 0.0  ;;  %v3944_v5 = vpop.f32.mrb[98].mxu1 }
 0x4ff   :  { %v2383_v12 = vadd.f32 %v3944_v5, %v5082_v45  ;;  %v2377_v15 = vpop.f32.mrb[99].mxu1 }
 0x500   :  { %v2378_v17 = vadd.f32 %v5082_v45, %v2377_v15  ;;  %4004 = vmatprep.mubr.msk.f32.mxu0 %vm505_vm1, %v2484_v2 }
 0x501   :  { %4005 = vmatmul.mubr.msk.f32.gmra.mrb[92].mxu0 %vm505_vm1, %v2485_v9  ;;  %v2487_v25 = vmax.f32 %v2383_v12, 0.0 }
 0x502   :  { %v2486_v20 = vmax.f32 %v2378_v17, 0.0  ;;  %v3947_v21 = vpop.f32.mrb[100].mxu1 }
 0x503   :  { %v2393_v27 = vadd.f32 %v3947_v21, %v5082_v45  ;;  %v2387_v31 = vpop.f32.mrb[101].mxu1 }
 0x504   :  { %v2388_v32 = vadd.f32 %v5082_v45, %v2387_v31  ;;  %4007 = vmatprep.mubr.msk.f32.mxu0 %vm505_vm1, %v2486_v20 }
 0x505   :  { %4008 = vmatmul.mubr.msk.f32.gmra.mrb[94].mxu0 %vm505_vm1, %v2487_v25  ;;  %v2489_v38 = vmax.f32 %v2393_v27, 0.0 }
 0x506   :  { %v2488_v33 = vmax.f32 %v2388_v32, 0.0  ;;  %v3950_v35 = vpop.f32.mrb[102].mxu1 }
 0x507   :  { %v2403_v47 = vadd.f32 %v3950_v35, %v5082_v45  ;;  %v2397_v42 = vpop.f32.mrb[103].mxu1 }
 0x508   :  { %v2398_v48 = vadd.f32 %v5082_v45, %v2397_v42  ;;  %4010 = vmatprep.mubr.msk.f32.mxu0 %vm505_vm1, %v2488_v33 }
 0x509   :  { %4011 = vmatmul.mubr.msk.f32.gmra.mrb[96].mxu0 %vm505_vm1, %v2489_v38  ;;  %v2491_v10 = vmax.f32 %v2403_v47, 0.0 }
 0x50a   :  { %v2490_v59 = vmax.f32 %v2398_v48, 0.0  ;;  %v3953_v52 = vpop.f32.mrb[104].mxu1 }
 0x50b   :  { %v2413_v56 = vadd.f32 %v3953_v52, %v5082_v45  ;;  %v2407_v57 = vpop.f32.mrb[105].mxu1 }
 0x50c   :  { %v2408_v58 = vadd.f32 %v5082_v45, %v2407_v57  ;;  %4013 = vmatprep.mubr.msk.f32.mxu0 %vm505_vm1, %v2490_v59 }
 0x50d   :  { %4014 = vmatmul.mubr.msk.f32.gmra.mrb[98].mxu0 %vm505_vm1, %v2491_v10  ;;  %v2493_v5 = vmax.f32 %v2413_v56, 0.0 }
 0x50e   :  { %v2492_v1 = vmax.f32 %v2408_v58, 0.0  ;;  %v3956_v2 = vpop.f32.mrb[106].mxu1 }
 0x50f   :  { %v2423_v9 = vadd.f32 %v3956_v2, %v5082_v45  ;;  %v2417_v12 = vpop.f32.mrb[107].mxu1 }
 0x510   :  { %v2418_v15 = vadd.f32 %v5082_v45, %v2417_v12  ;;  %4016 = vmatprep.mubr.msk.f32.mxu0 %vm505_vm1, %v2492_v1 }
 0x511   :  { %4017 = vmatmul.mubr.msk.f32.gmra.mrb[100].mxu0 %vm505_vm1, %v2493_v5  ;;  %v2495_v21 = vmax.f32 %v2423_v9, 0.0 }
 0x512   :  { %v2494_v17 = vmax.f32 %v2418_v15, 0.0  ;;  %v3959_v20 = vpop.f32.mrb[108].mxu1 }
 0x513   :  { %v2433_v25 = vadd.f32 %v3959_v20, %v5082_v45  ;;  %v2427_v27 = vpop.f32.mrb[109].mxu1  ;;  %v5163_v20 = vld [vmem:[%s5375_s8 + $0x5] ss:$0 sm:$0xff]  ;;  %s4183_s8 = smov [#allocation2]  }
 0x514   :  { %v2428_v31 = vadd.f32 %v5082_v45, %v2427_v27  ;;  %4019 = vmatprep.mubr.msk.f32.mxu0 %vm505_vm1, %v2494_v17  ;;  %s3156_s22 = sshll.u32 %s4183_s8, 4  ;;  %s3157_s22 = int_to_ptr.vmem [resolvable:$true] %s3156_s22 }
 0x515   :  { %4020 = vmatmul.mubr.msk.f32.gmra.mrb[102].mxu0 %vm505_vm1, %v2495_v21  ;;  %v2497_v35 = vmax.f32 %v2433_v25, 0.0  ;;  %s4157_s23 = scalar_lea.vmem %s3157_s22, 4864  ;;  %p4162_p1 = scmp.lt.s32.totalorder %s3157_s22, %s3157_s22 }
 0x516   :  { %v2496_v32 = vmax.f32 %v2428_v31, 0.0  ;;  %v3962_v33 = vpop.f32.mrb[110].mxu1  ;;  %p4158_p0 = scmp.ne.s32.totalorder %s3157_s22, %s4157_s23  ;;  %p4163_p2 = scmp.lt.s32.totalorder %s4157_s23, %s4157_s23 }
 0x517   :  { %v2443_v38 = vadd.f32 %v3962_v33, %v5082_v45  ;;  %v2437_v47 = vpop.f32.mrb[111].mxu1 }
 0x518   :  { %v2438_v42 = vadd.f32 %v5082_v45, %v2437_v47  ;;  %4022 = vmatprep.mubr.msk.f32.mxu0 %vm505_vm1, %v2496_v32  ;;  %p4164_p3 = por %p4163_p2, %p4162_p1 }
 0x519   :  { %4023 = vmatmul.mubr.msk.f32.gmra.mrb[104].mxu0 %vm505_vm1, %v2497_v35  ;;  %v2499_v52 = vmax.f32 %v2443_v38, 0.0 }
 0x51a   :  { %v2498_v48 = vmax.f32 %v2438_v42, 0.0  ;;  %v3965_v59 = vpop.f32.mrb[112].mxu1  ;;  %p4165_p4 = pnand %p4164_p3, %p4158_p0 }
 0x51b   :  { %v2453_v10 = vadd.f32 %v3965_v59, %v5082_v45  ;;  %v2447_v56 = vpop.f32.mrb[113].mxu1 }
 0x51c   :  { %v2448_v57 = vadd.f32 %v5082_v45, %v2447_v56  ;;  %4025 = vmatprep.mubr.msk.f32.mxu0 %vm505_vm1, %v2498_v48 }
 0x51d   :  { %4026 = vmatmul.mubr.msk.f32.gmra.mrb[106].mxu0 %vm505_vm1, %v2499_v52  ;;  %v2501_v2 = vmax.f32 %v2453_v10, 0.0 }
 0x51e   :  { %v2500_v58 = vmax.f32 %v2448_v57, 0.0  ;;  %v3968_v1 = vpop.f32.mrb[114].mxu1 }
 0x51f   :  { %v2463_v5 = vadd.f32 %v3968_v1, %v5082_v45  ;;  %v2457_v9 = vpop.f32.mrb[115].mxu1 }
 0x520   :  { %v2458_v12 = vadd.f32 %v5082_v45, %v2457_v9  ;;  %4028 = vmatprep.mubr.msk.f32.mxu0 %vm505_vm1, %v2500_v58 }
 0x521   :  { %4029 = vmatmul.mubr.msk.f32.gmra.mrb[108].mxu0 %vm505_vm1, %v2501_v2  ;;  %v2503_v17 = vmax.f32 %v2463_v5, 0.0 }
 0x522   :  { %v2502_v15 = vmax.f32 %v2458_v12, 0.0 }
 0x524   :  { %4031 = vmatprep.mubr.msk.f32.mxu0 %vm505_vm1, %v2502_v15 }
 0x525   :  { %4032 = vmatmul.mubr.msk.f32.gmra.mrb[110].mxu0 %vm505_vm1, %v2503_v17 }
 0x5b0   :  { %v3979_v21 = vpop.f32.mrb[74].mxu0 }
 0x5b1   :  { %v2701_v25 = vadd.f32 %v3979_v21, %v5163_v20  ;;  %v2695_v27 = vpop.f32.mrb[75].mxu0 }
 0x5b2   :  { %v2696_v45 = vadd.f32 %v5163_v20, %v2695_v27 }
 0x5b3   :  { %2924 = vrot.lane.b32.xlu1 %v2701_v25, %s4182_s21 }
 0x5b4   :  { %v3982_v31 = vpop.f32.mrb[76].mxu0  ;;  %2922 = vrot.lane.b32.xlu0 %v2696_v45, %s4182_s21 }
 0x5b5   :  { %v2711_v32 = vadd.f32 %v3982_v31, %v5163_v20  ;;  %v2705_v33 = vpop.f32.mrb[77].mxu0 }
 0x5b6   :  { %v2706_v35 = vadd.f32 %v5163_v20, %v2705_v33 }
 0x5b7   :  { %2928 = vrot.lane.b32.xlu1 %v2711_v32, %s4182_s21 }
 0x5b8   :  { %v3985_v38 = vpop.f32.mrb[78].mxu0  ;;  %2926 = vrot.lane.b32.xlu0 %v2706_v35, %s4182_s21 }
 0x5b9   :  { %v2721_v47 = vadd.f32 %v3985_v38, %v5163_v20  ;;  %v2715_v42 = vpop.f32.mrb[79].mxu0 }
 0x5ba   :  { %v2716_v48 = vadd.f32 %v5163_v20, %v2715_v42 }
 0x5bb   :  { %2932 = vrot.lane.b32.xlu1 %v2721_v47, %s4182_s21 }
 0x5bc   :  { %v3988_v59 = vpop.f32.mrb[80].mxu0  ;;  %2930 = vrot.lane.b32.xlu0 %v2716_v48, %s4182_s21 }
 0x5bd   :  { %v2731_v52 = vadd.f32 %v3988_v59, %v5163_v20  ;;  %v2725_v10 = vpop.f32.mrb[81].mxu0 }
 0x5be   :  { %v2726_v56 = vadd.f32 %v5163_v20, %v2725_v10 }
 0x5bf   :  { %2936 = vrot.lane.b32.xlu1 %v2731_v52, %s4182_s21 }
 0x5c0   :  { %v3991_v57 = vpop.f32.mrb[82].mxu0  ;;  %2934 = vrot.lane.b32.xlu0 %v2726_v56, %s4182_s21 }
 0x5c1   :  { %v2741_v58 = vadd.f32 %v3991_v57, %v5163_v20  ;;  %v2735_v1 = vpop.f32.mrb[83].mxu0 }
 0x5c2   :  { %v2736_v2 = vadd.f32 %v5163_v20, %v2735_v1 }
 0x5c3   :  { %2940 = vrot.lane.b32.xlu1 %v2741_v58, %s4182_s21 }
 0x5c4   :  { %v3994_v5 = vpop.f32.mrb[84].mxu0  ;;  %2938 = vrot.lane.b32.xlu0 %v2736_v2, %s4182_s21 }
 0x5c5   :  { %v2751_v9 = vadd.f32 %v3994_v5, %v5163_v20  ;;  %v2745_v12 = vpop.f32.mrb[85].mxu0 }
 0x5c6   :  { %v2746_v15 = vadd.f32 %v5163_v20, %v2745_v12 }
 0x5c7   :  { %2944 = vrot.lane.b32.xlu1 %v2751_v9, %s4182_s21 }
 0x5c8   :  { %v3997_v17 = vpop.f32.mrb[86].mxu0  ;;  %2942 = vrot.lane.b32.xlu0 %v2746_v15, %s4182_s21 }
 0x5c9   :  { %v2761_v21 = vadd.f32 %v3997_v17, %v5163_v20  ;;  %v2755_v25 = vpop.f32.mrb[87].mxu0 }
 0x5ca   :  { %v2756_v27 = vadd.f32 %v5163_v20, %v2755_v25 }
 0x5cb   :  { %2948 = vrot.lane.b32.xlu1 %v2761_v21, %s4182_s21 }
 0x5cc   :  { %v4000_v45 = vpop.f32.mrb[88].mxu0  ;;  %2946 = vrot.lane.b32.xlu0 %v2756_v27, %s4182_s21 }
 0x5cd   :  { %v2771_v31 = vadd.f32 %v4000_v45, %v5163_v20  ;;  %v2765_v32 = vpop.f32.mrb[89].mxu0 }
 0x5ce   :  { %v2766_v33 = vadd.f32 %v5163_v20, %v2765_v32 }
 0x5cf   :  { %2952 = vrot.lane.b32.xlu1 %v2771_v31, %s4182_s21 }
 0x5d0   :  { %v4003_v35 = vpop.f32.mrb[90].mxu0  ;;  %2950 = vrot.lane.b32.xlu0 %v2766_v33, %s4182_s21 }
 0x5d1   :  { %v2781_v38 = vadd.f32 %v4003_v35, %v5163_v20  ;;  %v2775_v47 = vpop.f32.mrb[91].mxu0 }
 0x5d2   :  { %v2776_v42 = vadd.f32 %v5163_v20, %v2775_v47 }
 0x5d3   :  { %2956 = vrot.lane.b32.xlu1 %v2781_v38, %s4182_s21 }
 0x5d4   :  { %v4006_v48 = vpop.f32.mrb[92].mxu0  ;;  %2954 = vrot.lane.b32.xlu0 %v2776_v42, %s4182_s21 }
 0x5d5   :  { %v2791_v59 = vadd.f32 %v4006_v48, %v5163_v20  ;;  %v2785_v52 = vpop.f32.mrb[93].mxu0 }
 0x5d6   :  { %v2786_v10 = vadd.f32 %v5163_v20, %v2785_v52 }
 0x5d7   :  { %2960 = vrot.lane.b32.xlu1 %v2791_v59, %s4182_s21 }
 0x5d8   :  { %v4009_v56 = vpop.f32.mrb[94].mxu0  ;;  %2958 = vrot.lane.b32.xlu0 %v2786_v10, %s4182_s21 }
 0x5d9   :  { %v2801_v57 = vadd.f32 %v4009_v56, %v5163_v20  ;;  %v2795_v58 = vpop.f32.mrb[95].mxu0 }
 0x5da   :  { %v2796_v1 = vadd.f32 %v5163_v20, %v2795_v58 }
 0x5db   :  { %2964 = vrot.lane.b32.xlu1 %v2801_v57, %s4182_s21 }
 0x5dc   :  { %v4012_v2 = vpop.f32.mrb[96].mxu0  ;;  %2962 = vrot.lane.b32.xlu0 %v2796_v1, %s4182_s21 }
 0x5dd   :  { %v2811_v5 = vadd.f32 %v4012_v2, %v5163_v20  ;;  %v2805_v9 = vpop.f32.mrb[97].mxu0 }
 0x5de   :  { %v2806_v12 = vadd.f32 %v5163_v20, %v2805_v9 }
 0x5df   :  { %2968 = vrot.lane.b32.xlu1 %v2811_v5, %s4182_s21 }
 0x5e0   :  { %v4015_v15 = vpop.f32.mrb[98].mxu0  ;;  %2966 = vrot.lane.b32.xlu0 %v2806_v12, %s4182_s21 }
 0x5e1   :  { %v2821_v17 = vadd.f32 %v4015_v15, %v5163_v20  ;;  %v2815_v21 = vpop.f32.mrb[99].mxu0 }
 0x5e2   :  { %v2816_v25 = vadd.f32 %v5163_v20, %v2815_v21 }
 0x5e3   :  { %2972 = vrot.lane.b32.xlu1 %v2821_v17, %s4182_s21 }
 0x5e4   :  { %v4018_v27 = vpop.f32.mrb[100].mxu0  ;;  %2970 = vrot.lane.b32.xlu0 %v2816_v25, %s4182_s21 }
 0x5e5   :  { %v2831_v45 = vadd.f32 %v4018_v27, %v5163_v20  ;;  %v2825_v31 = vpop.f32.mrb[101].mxu0 }
 0x5e6   :  { %v2826_v32 = vadd.f32 %v5163_v20, %v2825_v31 }
 0x5e7   :  { %2976 = vrot.lane.b32.xlu1 %v2831_v45, %s4182_s21 }
 0x5e8   :  { %v4021_v33 = vpop.f32.mrb[102].mxu0  ;;  %2974 = vrot.lane.b32.xlu0 %v2826_v32, %s4182_s21 }
 0x5e9   :  { %v2841_v35 = vadd.f32 %v4021_v33, %v5163_v20  ;;  %v2835_v38 = vpop.f32.mrb[103].mxu0 }
 0x5ea   :  { %v2836_v47 = vadd.f32 %v5163_v20, %v2835_v38 }
 0x5eb   :  { %2980 = vrot.lane.b32.xlu1 %v2841_v35, %s4182_s21 }
 0x5ec   :  { %v4024_v42 = vpop.f32.mrb[104].mxu0  ;;  %2978 = vrot.lane.b32.xlu0 %v2836_v47, %s4182_s21 }
 0x5ed   :  { %v2851_v48 = vadd.f32 %v4024_v42, %v5163_v20  ;;  %v2845_v59 = vpop.f32.mrb[105].mxu0 }
 0x5ee   :  { %v2846_v52 = vadd.f32 %v5163_v20, %v2845_v59 }
 0x5ef   :  { %2984 = vrot.lane.b32.xlu1 %v2851_v48, %s4182_s21 }
 0x5f0   :  { %v4027_v10 = vpop.f32.mrb[106].mxu0  ;;  %2982 = vrot.lane.b32.xlu0 %v2846_v52, %s4182_s21 }
 0x5f1   :  { %v2861_v56 = vadd.f32 %v4027_v10, %v5163_v20  ;;  %v2855_v57 = vpop.f32.mrb[107].mxu0 }
 0x5f2   :  { %v2856_v58 = vadd.f32 %v5163_v20, %v2855_v57 }
 0x5f3   :  { %2988 = vrot.lane.b32.xlu1 %v2861_v56, %s4182_s21 }
 0x5f4   :  { %v4030_v1 = vpop.f32.mrb[108].mxu0  ;;  %2986 = vrot.lane.b32.xlu0 %v2856_v58, %s4182_s21 }
 0x5f5   :  { %v2871_v2 = vadd.f32 %v4030_v1, %v5163_v20  ;;  %v2865_v5 = vpop.f32.mrb[109].mxu0 }
 0x5f6   :  { %v2866_v9 = vadd.f32 %v5163_v20, %v2865_v5 }
 0x5f7   :  { %2992 = vrot.lane.b32.xlu1 %v2871_v2, %s4182_s21 }
 0x5f8   :  { %2990 = vrot.lane.b32.xlu0 %v2866_v9, %s4182_s21  ;;  %v4033_v12 = vpop.f32.mrb[110].mxu0 }
 0x5f9   :  { %v2881_v15 = vadd.f32 %v4033_v12, %v5163_v20  ;;  %v2875_v17 = vpop.f32.mrb[111].mxu0 }
 0x5fa   :  { %v2876_v21 = vadd.f32 %v5163_v20, %v2875_v17 }
 0x5fb   :  { %2996 = vrot.lane.b32.xlu1 %v2881_v15, %s4182_s21 }
 0x5fc   :  { %2994 = vrot.lane.b32.xlu0 %v2876_v21, %s4182_s21 }
 0x625   :  { %v2925_v25 = vpop.permute.xlu1 %2924 }
 0x626   :  { %v3037_v27 = vsel %vm922_vm2, %v4601_v37, %v2925_v25  ;;  %v2923_v45 = vpop.permute.xlu0 %2922 }
 0x627   :  { %v3076_v31 = vsel %vm3074_vm4, %v3037_v27, 0.0  ;;  %v3036_v32 = vsel %vm922_vm2, %v4604_v39, %v2923_v45 }
 0x628   :  { %3114 = vst [vmem:[#allocation2 + $0x8] sm:$0xff] %v3076_v31  ;;  %v3075_v33 = vsel %vm3074_vm4, %v3036_v32, 0.0 }
 0x629   :  { %3113 = vst [vmem:[#allocation2] sm:$0xff] %v3075_v33  ;;  %v2929_v20 = vpop.permute.xlu1 %2928 }
 0x62a   :  { %v3039_v35 = vsel %vm922_vm2, %v4609_v43, %v2929_v20  ;;  %v2927_v38 = vpop.permute.xlu0 %2926 }
 0x62b   :  { %v3078_v47 = vsel %vm3074_vm4, %v3039_v35, 0.0  ;;  %v3038_v37 = vsel %vm922_vm2, %v4612_v46, %v2927_v38 }
 0x62c   :  { %3116 = vst [vmem:[#allocation2 + $0x18] sm:$0xff] %v3078_v47  ;;  %v3077_v42 = vsel %vm3074_vm4, %v3038_v37, 0.0 }
 0x62d   :  { %3115 = vst [vmem:[#allocation2 + $0x10] sm:$0xff] %v3077_v42  ;;  %v2933_v48 = vpop.permute.xlu1 %2932 }
 0x62e   :  { %v3041_v39 = vsel %vm922_vm2, %v4617_v51, %v2933_v48  ;;  %v2931_v59 = vpop.permute.xlu0 %2930 }
 0x62f   :  { %v3080_v52 = vsel %vm3074_vm4, %v3041_v39, 0.0  ;;  %v3040_v43 = vsel %vm922_vm2, %v4620_v54, %v2931_v59 }
 0x630   :  { %3118 = vst [vmem:[#allocation2 + $0x28] sm:$0xff] %v3080_v52  ;;  %v3079_v10 = vsel %vm3074_vm4, %v3040_v43, 0.0 }
 0x631   :  { %3117 = vst [vmem:[#allocation2 + $0x20] sm:$0xff] %v3079_v10  ;;  %v2937_v56 = vpop.permute.xlu1 %2936 }
 0x632   :  { %v3043_v46 = vsel %vm922_vm2, %v4625_v60, %v2937_v56  ;;  %v2935_v57 = vpop.permute.xlu0 %2934 }
 0x633   :  { %v3082_v58 = vsel %vm3074_vm4, %v3043_v46, 0.0  ;;  %v3042_v51 = vsel %vm922_vm2, %v4628_v63, %v2935_v57 }
 0x634   :  { %3120 = vst [vmem:[#allocation2 + $0x38] sm:$0xff] %v3082_v58  ;;  %v3081_v1 = vsel %vm3074_vm4, %v3042_v51, 0.0 }
 0x635   :  { %3119 = vst [vmem:[#allocation2 + $0x30] sm:$0xff] %v3081_v1  ;;  %v2941_v2 = vpop.permute.xlu1 %2940 }
 0x636   :  { %v3045_v54 = vsel %vm922_vm2, %v4633_v4, %v2941_v2  ;;  %v2939_v5 = vpop.permute.xlu0 %2938 }
 0x637   :  { %v3084_v9 = vsel %vm3074_vm4, %v3045_v54, 0.0  ;;  %v3044_v60 = vsel %vm922_vm2, %v4636_v8, %v2939_v5 }
 0x638   :  { %3122 = vst [vmem:[#allocation2 + $0x48] sm:$0xff] %v3084_v9  ;;  %v3083_v12 = vsel %vm3074_vm4, %v3044_v60, 0.0 }
 0x639   :  { %3121 = vst [vmem:[#allocation2 + $0x40] sm:$0xff] %v3083_v12  ;;  %v2945_v15 = vpop.permute.xlu1 %2944 }
 0x63a   :  { %v3047_v63 = vsel %vm922_vm2, %v4642_v14, %v2945_v15  ;;  %v2943_v17 = vpop.permute.xlu0 %2942 }
 0x63b   :  { %v3086_v21 = vsel %vm3074_vm4, %v3047_v63, 0.0  ;;  %v3046_v4 = vsel %vm922_vm2, %v4645_v18, %v2943_v17 }
 0x63c   :  { %3124 = vst [vmem:[#allocation2 + $0x58] sm:$0xff] %v3086_v21  ;;  %v3085_v25 = vsel %vm3074_vm4, %v3046_v4, 0.0 }
 0x63d   :  { %3123 = vst [vmem:[#allocation2 + $0x50] sm:$0xff] %v3085_v25  ;;  %v2949_v27 = vpop.permute.xlu1 %2948 }
 0x63e   :  { %v3049_v8 = vsel %vm922_vm2, %v4652_v24, %v2949_v27  ;;  %v2947_v45 = vpop.permute.xlu0 %2946 }
 0x63f   :  { %v3088_v31 = vsel %vm3074_vm4, %v3049_v8, 0.0  ;;  %v3048_v14 = vsel %vm922_vm2, %v4655_v28, %v2947_v45 }
 0x640   :  { %3126 = vst [vmem:[#allocation2 + $0x68] sm:$0xff] %v3088_v31  ;;  %v3087_v32 = vsel %vm3074_vm4, %v3048_v14, 0.0 }
 0x641   :  { %3125 = vst [vmem:[#allocation2 + $0x60] sm:$0xff] %v3087_v32  ;;  %v2953_v33 = vpop.permute.xlu1 %2952 }
 0x642   :  { %v3051_v18 = vsel %vm922_vm2, %v4662_v34, %v2953_v33  ;;  %v2951_v20 = vpop.permute.xlu0 %2950 }
 0x643   :  { %v3090_v35 = vsel %vm3074_vm4, %v3051_v18, 0.0  ;;  %v3050_v24 = vsel %vm922_vm2, %v4665_v40, %v2951_v20 }
 0x644   :  { %3128 = vst [vmem:[#allocation2 + $0x78] sm:$0xff] %v3090_v35  ;;  %v3089_v38 = vsel %vm3074_vm4, %v3050_v24, 0.0 }
 0x645   :  { %3127 = vst [vmem:[#allocation2 + $0x70] sm:$0xff] %v3089_v38  ;;  %v2957_v47 = vpop.permute.xlu1 %2956 }
 0x646   :  { %v3053_v28 = vsel %vm922_vm2, %v4672_v49, %v2957_v47  ;;  %v2955_v37 = vpop.permute.xlu0 %2954 }
 0x647   :  { %v3092_v42 = vsel %vm3074_vm4, %v3053_v28, 0.0  ;;  %v3052_v34 = vsel %vm922_vm2, %v4675_v53, %v2955_v37 }
 0x648   :  { %3130 = vst [vmem:[#allocation2 + $0x88] sm:$0xff] %v3092_v42  ;;  %v3091_v48 = vsel %vm3074_vm4, %v3052_v34, 0.0 }
 0x649   :  { %3129 = vst [vmem:[#allocation2 + $0x80] sm:$0xff] %v3091_v48  ;;  %v2961_v39 = vpop.permute.xlu1 %2960 }
 0x64a   :  { %v3055_v40 = vsel %vm922_vm2, %v4682_v62, %v2961_v39  ;;  %v2959_v59 = vpop.permute.xlu0 %2958 }
 0x64b   :  { %v3094_v52 = vsel %vm3074_vm4, %v3055_v40, 0.0  ;;  %v3054_v49 = vsel %vm922_vm2, %v4685_v3, %v2959_v59 }
 0x64c   :  { %3132 = vst [vmem:[#allocation2 + $0x98] sm:$0xff] %v3094_v52  ;;  %v3093_v43 = vsel %vm3074_vm4, %v3054_v49, 0.0 }
 0x64d   :  { %3131 = vst [vmem:[#allocation2 + $0x90] sm:$0xff] %v3093_v43  ;;  %v2965_v10 = vpop.permute.xlu1 %2964 }
 0x64e   :  { %v3057_v53 = vsel %vm922_vm2, %v4692_v11, %v2965_v10  ;;  %v2963_v56 = vpop.permute.xlu0 %2962 }
 0x64f   :  { %v3096_v46 = vsel %vm3074_vm4, %v3057_v53, 0.0  ;;  %v3056_v62 = vsel %vm922_vm2, %v4695_v16, %v2963_v56 }
 0x650   :  { %3134 = vst [vmem:[#allocation2 + $0xa8] sm:$0xff] %v3096_v46  ;;  %v3095_v57 = vsel %vm3074_vm4, %v3056_v62, 0.0 }
 0x651   :  { %3133 = vst [vmem:[#allocation2 + $0xa0] sm:$0xff] %v3095_v57  ;;  %v2969_v58 = vpop.permute.xlu1 %2968 }
 0x652   :  { %v3059_v3 = vsel %vm922_vm2, %v4702_v23, %v2969_v58  ;;  %v2967_v51 = vpop.permute.xlu0 %2966 }
 0x653   :  { %v3098_v1 = vsel %vm3074_vm4, %v3059_v3, 0.0  ;;  %v3058_v11 = vsel %vm922_vm2, %v4705_v29, %v2967_v51 }
 0x654   :  { %3136 = vst [vmem:[#allocation2 + $0xb8] sm:$0xff] %v3098_v1  ;;  %v3097_v2 = vsel %vm3074_vm4, %v3058_v11, 0.0 }
 0x655   :  { %3135 = vst [vmem:[#allocation2 + $0xb0] sm:$0xff] %v3097_v2  ;;  %v2973_v54 = vpop.permute.xlu1 %2972 }
 0x656   :  { %v3061_v16 = vsel %vm922_vm2, %v4712_v36, %v2973_v54  ;;  %v2971_v5 = vpop.permute.xlu0 %2970 }
 0x657   :  { %v3100_v9 = vsel %vm3074_vm4, %v3061_v16, 0.0  ;;  %v3060_v23 = vsel %vm922_vm2, %v4715_v44, %v2971_v5 }
 0x658   :  { %3138 = vst [vmem:[#allocation2 + $0xc8] sm:$0xff] %v3100_v9  ;;  %v3099_v60 = vsel %vm3074_vm4, %v3060_v23, 0.0 }
 0x659   :  { %3137 = vst [vmem:[#allocation2 + $0xc0] sm:$0xff] %v3099_v60  ;;  %v2977_v12 = vpop.permute.xlu1 %2976 }
 0x65a   :  { %v3063_v29 = vsel %vm922_vm2, %v4722_v55, %v2977_v12  ;;  %v2975_v15 = vpop.permute.xlu0 %2974 }
 0x65b   :  { %v3102_v63 = vsel %vm3074_vm4, %v3063_v29, 0.0  ;;  %v3062_v36 = vsel %vm922_vm2, %v4725_v61, %v2975_v15 }
 0x65c   :  { %3140 = vst [vmem:[#allocation2 + $0xd8] sm:$0xff] %v3102_v63  ;;  %v3101_v17 = vsel %vm3074_vm4, %v3062_v36, 0.0 }
 0x65d   :  { %3139 = vst [vmem:[#allocation2 + $0xd0] sm:$0xff] %v3101_v17  ;;  %v2981_v21 = vpop.permute.xlu1 %2980 }
 0x65e   :  { %v3065_v44 = vsel %vm922_vm2, %v4732_v7, %v2981_v21  ;;  %v2979_v4 = vpop.permute.xlu0 %2978 }
 0x65f   :  { %v3104_v25 = vsel %vm3074_vm4, %v3065_v44, 0.0  ;;  %v3064_v55 = vsel %vm922_vm2, %v4735_v13, %v2979_v4 }
 0x660   :  { %3142 = vst [vmem:[#allocation2 + $0xe8] sm:$0xff] %v3104_v25  ;;  %v3103_v27 = vsel %vm3074_vm4, %v3064_v55, 0.0 }
 0x661   :  { %3141 = vst [vmem:[#allocation2 + $0xe0] sm:$0xff] %v3103_v27  ;;  %v2985_v8 = vpop.permute.xlu1 %2984 }
 0x662   :  { %v3067_v61 = vsel %vm922_vm2, %v4742_v22, %v2985_v8  ;;  %v2983_v45 = vpop.permute.xlu0 %2982 }
 0x663   :  { %v3106_v31 = vsel %vm3074_vm4, %v3067_v61, 0.0  ;;  %v3066_v7 = vsel %vm922_vm2, %v4745_v30, %v2983_v45 }
 0x664   :  { %3144 = vst [vmem:[#allocation2 + $0xf8] sm:$0xff] %v3106_v31  ;;  %v3105_v14 = vsel %vm3074_vm4, %v3066_v7, 0.0 }
 0x665   :  { %3143 = vst [vmem:[#allocation2 + $0xf0] sm:$0xff] %v3105_v14  ;;  %v2989_v32 = vpop.permute.xlu1 %2988 }
 0x666   :  { %v3069_v13 = vsel %vm922_vm2, %v4752_v41, %v2989_v32  ;;  %v2987_v33 = vpop.permute.xlu0 %2986 }
 0x667   :  { %v3108_v18 = vsel %vm3074_vm4, %v3069_v13, 0.0  ;;  %v3068_v22 = vsel %vm922_vm2, %v4755_v50, %v2987_v33 }
 0x668   :  { %3146 = vst [vmem:[#allocation2 + $0x108] sm:$0xff] %v3108_v18  ;;  %v3107_v20 = vsel %vm3074_vm4, %v3068_v22, 0.0 }
 0x669   :  { %3145 = vst [vmem:[#allocation2 + $0x100] sm:$0xff] %v3107_v20  ;;  %v2993_v35 = vpop.permute.xlu1 %2992 }
 0x66a   :  { %v3071_v30 = vsel %vm922_vm2, %v4762_v0, %v2993_v35  ;;  %v2991_v24 = vpop.permute.xlu0 %2990 }
 0x66b   :  { %v3110_v38 = vsel %vm3074_vm4, %v3071_v30, 0.0  ;;  %v3070_v41 = vsel %vm922_vm2, %v4765_v6, %v2991_v24 }
 0x66c   :  { %3148 = vst [vmem:[#allocation2 + $0x118] sm:$0xff] %v3110_v38  ;;  %v3109_v47 = vsel %vm3074_vm4, %v3070_v41, 0.0 }
 0x66d   :  { %3147 = vst [vmem:[#allocation2 + $0x110] sm:$0xff] %v3109_v47  ;;  %v2997_v50 = vpop.permute.xlu1 %2996 }
 0x66e   :  { %v3073_v28 = vsel %vm922_vm2, %v4772_v19, %v2997_v50  ;;  %v2995_v37 = vpop.permute.xlu0 %2994 }
 0x66f   :  { %v3112_v0 = vsel %vm3074_vm4, %v3073_v28, 0.0  ;;  %v3072_v42 = vsel %vm922_vm2, %v4775_v26, %v2995_v37 }
 0x670   :  { %3150 = vst [vmem:[#allocation2 + $0x128] sm:$0xff] %v3112_v0  ;;  %v3111_v6 = vsel %vm3074_vm4, %v3072_v42, 0.0 }
 0x671   :  { %3149 = vst [vmem:[#allocation2 + $0x120] sm:$0xff] %v3111_v6 }
 0x672   :  { %4168 = shalt.err (!%p4165_p4)
}
 0x673   :  { %s4169_s25 = scalar_lea.hbm %s5376_s9, 4864 }
 0x674   :  { %p4170_p5 = scmp.ne.s32.totalorder %s5376_s9, %s4169_s25  ;;  %p4173_p6 = scmp.lt.u32.totalorder %s4169_s25, %s5376_s9 }
 0x676   :  { %p4175_p7 = pnand %p4173_p6, %p4170_p5 }
 0x678   :  { %4178 = shalt.err (!%p4175_p7)
}
 0x679   :  { %s4184_s28 = smov 128   ;;  %s4185_s29 = smov 8  }
 0x67a   :  { %3162 = dma.vmem_to_hbm [thread:$0]  %s3157_s22, 4864, %s5376_s9, [#allocation3], %s4184_s28, %s4184_s28, %s4185_s29  }
 0x67b   :  { %4179 = dma.done.wait [#allocation3], 4864  }
 0x67c   :  { %4180 = vsyncadd [#allocation3], 4294962432 }
 0x67d   :  { %3166 = vsyncpa [#allocation3], 1 }

</bundles_post_ra>
